<compile_context>
chip_gen: v7x
topology: tpu7x:2x2x1
jax: 0.10.0
libtpu: 0.0.40
codegen_flags: <defaults>
</compile_context>

<pallas_src>
import functools

import jax
import jax.numpy as jnp
from jax import lax
from jax.experimental import pallas as pl
from jax.experimental.pallas import tpu as pltpu


_VMEM = pl.BlockSpec(memory_space=pltpu.MemorySpace.VMEM)
_NEG = jnp.float32(-1e30)


# ----------------------------------------------------------------------------
# Fused Pallas kernel: T x GATConv (heads=1, dense mask) + gated readout + MLP
# ----------------------------------------------------------------------------
def _fused_gat_kernel(x0_ref,
                      wext1_ref, bias1_ref,
                      wext2_ref, bias2_ref,
                      maskb_ref, memb_ref, aux_ref,
                      wg_i_ref, wg_f_ref, bg_ref, wt_ref, bt_ref,
                      w1g_ref, w1a_ref, b1r_ref, w2r_ref, b2r_ref,
                      w3_ref, b3_ref,
                      out_ref,
                      msg_ref, ad_ref,
                      *, num_timesteps, tile_d):
    """Fused GATLoadBalancing forward.

    x0:    [N, H]    fp32 initial node states (N already padded)
    wext*: [H, H+2]  bf16 = [W | W@att_dst^T | W@att_src^T]
    bias*: [1, H]    fp32 GAT output bias
    maskb: [N, N]    bf16 additive bias, 0 where edge s->d (incl. self loop),
                     -1e30 elsewhere
    memb:  [G, N]    bf16 graph membership, aux: [G, A] bf16
    out:   [G, C]    fp32 logits
    msg:   [N, H]    fp32 VMEM scratch (per-layer message accumulator)
    ad:    [N, 1]    fp32 VMEM scratch (alpha_dst column)
    """
    n = x0_ref.shape[0]
    h = wext1_ref.shape[0]
    n_tiles = n // tile_d

    x0 = x0_ref[...]                                    # [N, H] fp32
    cur = x0

    layer_params = ((wext1_ref, bias1_ref), (wext2_ref, bias2_ref))

    # ---- message passing (static unroll over timesteps) ----
    for t in range(num_timesteps):
        wext_ref, bias_ref = layer_params[t % 2]
        x_bf = cur.astype(jnp.bfloat16)

        # one MXU matmul gives h, alpha_dst and alpha_src together
        hx = jnp.dot(x_bf, wext_ref[...],
                     preferred_element_type=jnp.float32)        # [N, H+2]
        h_bf = hx[:, :h].astype(jnp.bfloat16)                   # [N, H]
        ad_ref[...] = hx[:, h:h + 1]                            # [N, 1]
        # hoisted relayout: lane-major source row, once per layer
        alpha_src_row = jnp.transpose(hx[:, h + 1:h + 2])       # [1, N]

        def tile_body(ti, carry):
            r0 = pl.multiple_of(ti * tile_d, tile_d)
            a_d = ad_ref[pl.ds(r0, tile_d), :]                  # [tile_d, 1]
            mb = maskb_ref[pl.ds(r0, tile_d), :].astype(jnp.float32)

            logits = a_d + alpha_src_row                        # [tile_d, N]
            # LeakyReLU(negative_slope=0.2): mul + max (no select)
            logits = jnp.maximum(logits, 0.2 * logits)
            # additive mask bias (no compare/select)
            logits = logits + mb
            logits = logits - jnp.max(logits, axis=-1, keepdims=True)
            # masked entries underflow to exactly 0 (self-loop invariant)
            p = jnp.exp(logits)
            inv = pl.reciprocal(jnp.sum(p, axis=-1, keepdims=True),
                                approx=True)
            attn = (p * inv).astype(jnp.bfloat16)               # [tile_d, N]

            msg_ref[pl.ds(r0, tile_d), :] = jnp.dot(
                attn, h_bf, preferred_element_type=jnp.float32)
            return carry

        lax.fori_loop(0, n_tiles, tile_body, 0, unroll=(n_tiles <= 4))
        cur = msg_ref[...] + bias_ref[...]                      # [N, H]

    # ---- gated readout + per-graph sum pool + MLP ----
    init_bf = x0.astype(jnp.bfloat16)
    fin_bf = cur.astype(jnp.bfloat16)

    gate = jax.nn.sigmoid(
        jnp.dot(init_bf, wg_i_ref[...], preferred_element_type=jnp.float32)
        + jnp.dot(fin_bf, wg_f_ref[...], preferred_element_type=jnp.float32)
        + bg_ref[...])
    trans = (jnp.dot(fin_bf, wt_ref[...], preferred_element_type=jnp.float32)
             + bt_ref[...])
    nodewise = (gate * trans).astype(jnp.bfloat16)              # [N, H]

    # segment-sum over graphs as membership-matrix matmul (MXU)
    graph_x = jnp.dot(memb_ref[...], nodewise,
                      preferred_element_type=jnp.float32)       # [G, H]

    h1 = (jnp.dot(graph_x.astype(jnp.bfloat16), w1g_ref[...],
                  preferred_element_type=jnp.float32)
          + jnp.dot(aux_ref[...], w1a_ref[...],
                    preferred_element_type=jnp.float32)
          + b1r_ref[...])
    h1 = jnp.maximum(h1, 0.0)
    h2 = (jnp.dot(h1.astype(jnp.bfloat16), w2r_ref[...],
                  preferred_element_type=jnp.float32) + b2r_ref[...])
    h2 = jnp.maximum(h2, 0.0)
    out_ref[...] = (jnp.dot(h2.astype(jnp.bfloat16), w3_ref[...],
                            preferred_element_type=jnp.float32) + b3_ref[...])


# ----------------------------------------------------------------------------
# Wrapper
# ----------------------------------------------------------------------------
def _round_up(x, m):
    return ((x + m - 1) // m) * m


def _tile_plan(n, target=256):
    """Returns (n_pad, tile_d) with tile_d a multiple of 8 and n_pad % tile_d == 0."""
    n8 = _round_up(n, 8)
    if n8 <= target:
        return n8, n8
    return _round_up(n, target), target


def fused_gat_forward(x0, mp1, mp2, mask_bias_bf16, memb_bf16, aux, rp,
                      num_timesteps):
    n, hdim = x0.shape
    g = memb_bf16.shape[0]
    c = rp["w3"].shape[1]
    bf = jnp.bfloat16

    n_pad, tile_d = _tile_plan(n)
    if n_pad > n:
        pad = n_pad - n
        x0 = jnp.pad(x0, ((0, pad), (0, 0)))
        mask_bias_bf16 = jnp.pad(mask_bias_bf16.astype(jnp.float32),
                                 ((0, pad), (0, pad)),
                                 constant_values=float(_NEG))
        # padded destination rows get a self loop -> finite softmax, no NaNs
        idx = jnp.arange(n, n_pad)
        mask_bias_bf16 = mask_bias_bf16.at[idx, idx].set(0.0).astype(bf)
        memb_bf16 = jnp.pad(memb_bf16, ((0, 0), (0, pad)))

    def prep_gat(p):
        w = p["w"]
        v_dst = jnp.dot(w, p["att_dst"].T)     # [H, 1]
        v_src = jnp.dot(w, p["att_src"].T)     # [H, 1]
        w_ext = jnp.concatenate([w, v_dst, v_src], axis=1)   # [H, H+2]
        return w_ext.astype(bf), p["bias"]

    wext1, b1 = prep_gat(mp1)
    wext2, b2 = prep_gat(mp2)

    args = (x0,
            wext1, b1, wext2, b2,
            mask_bias_bf16, memb_bf16, aux.astype(bf),
            rp["wg_i"].astype(bf), rp["wg_f"].astype(bf), rp["bg"],
            rp["wt"].astype(bf), rp["bt"],
            rp["w1g"].astype(bf), rp["w1a"].astype(bf), rp["b1"],
            rp["w2"].astype(bf), rp["b2"],
            rp["w3"].astype(bf), rp["b3"])

    # Size the scoped-VMEM cap from the dominant array (mask); 32 MiB is the
    # v6e/v7x scoped default and would be the binding cap as N grows.
    mask_bytes = n_pad * n_pad * 2
    vmem_limit = int(max(48 << 20, min(100 << 20, 4 * mask_bytes + (16 << 20))))

    kernel = functools.partial(_fused_gat_kernel,
                               num_timesteps=num_timesteps, tile_d=tile_d)
    return pl.pallas_call(
        kernel,
        out_shape=jax.ShapeDtypeStruct((g, c), jnp.float32),
        in_specs=[_VMEM] * len(args),
        out_specs=_VMEM,
        scratch_shapes=[pltpu.VMEM((n_pad, hdim), jnp.float32),
                        pltpu.VMEM((n_pad, 1), jnp.float32)],
        compiler_params=pltpu.CompilerParams(vmem_limit_bytes=vmem_limit),
    )(*args)


# ----------------------------------------------------------------------------
# Model (parameters + forward glue)
# ----------------------------------------------------------------------------
def init_params(key, vocab_size, hidden_size, num_classes, aux_features_dim,
                graph_x_layer_size, discretize_problem):
    out_dim = num_classes if discretize_problem else 1
    h, lsz, a = hidden_size, graph_x_layer_size, aux_features_dim
    keys = iter(jax.random.split(key, 32))

    def nrm(shape, scale=0.1):
        return jax.random.normal(next(keys), shape, jnp.float32) * scale

    def gat_params():
        return dict(w=nrm((h, h)),
                    att_src=nrm((1, h)),
                    att_dst=nrm((1, h)),
                    bias=jnp.zeros((1, h), jnp.float32))

    return dict(
        embed=nrm((vocab_size, h), 1.0),
        mp1=gat_params(),
        mp2=gat_params(),
        readout=dict(
            wg_i=nrm((h, h)), wg_f=nrm((h, h)), bg=jnp.zeros((1, h), jnp.float32),
            wt=nrm((h, h)), bt=jnp.zeros((1, h), jnp.float32),
            w1g=nrm((h, lsz)), w1a=nrm((a, lsz)), b1=jnp.zeros((1, lsz), jnp.float32),
            w2=nrm((lsz, lsz)), b2=jnp.zeros((1, lsz), jnp.float32),
            w3=nrm((lsz, out_dim)), b3=jnp.zeros((1, out_dim), jnp.float32),
        ),
    )


def build_adjacency_bias(edge_index, num_nodes):
    """Additive attention bias: bias[d, s] = 0 for every edge s->d and for the
    self loop d==d (matches PyG GATConv add_self_loops=True), -1e30 elsewhere.
    The per-row self loop is the invariant that makes the 'no second mask
    after exp' optimization safe."""
    src, dst = edge_index[0], edge_index[1]
    bias = jnp.full((num_nodes, num_nodes), _NEG, jnp.float32)
    bias = bias.at[dst, src].set(0.0)
    diag = jnp.arange(num_nodes)
    bias = bias.at[diag, diag].set(0.0)
    return bias.astype(jnp.bfloat16)


@functools.partial(jax.jit, static_argnames=("message_passing_timesteps",))
def gat_load_balancing_forward(params, node_vocab_ids, adj_bias, graph_memb,
                               wgsize_log1p, transfer_bytes_log1p,
                               message_passing_timesteps):
    # aux_features = stack((wgsize_log1p, transfer_bytes_log1p), dim=1)
    aux_features = jnp.stack([wgsize_log1p, transfer_bytes_log1p], axis=1)
    # NodeEmbeddings: embedding-table lookup (JAX gather glue outside kernel)
    node_states = params["embed"][node_vocab_ids].astype(jnp.float32)
    return fused_gat_forward(node_states, params["mp1"], params["mp2"],
                             adj_bias, graph_memb.astype(jnp.bfloat16),
                             aux_features, params["readout"],
                             message_passing_timesteps)


# ----------------------------------------------------------------------------
# Pure-JAX fp32 reference (same semantics, for validation)
# ----------------------------------------------------------------------------
def reference_forward(params, node_vocab_ids, adj_bias, graph_memb,
                      wgsize_log1p, transfer_bytes_log1p, timesteps):
    aux = jnp.stack([wgsize_log1p, transfer_bytes_log1p], axis=1)
    x = params["embed"][node_vocab_ids].astype(jnp.float32)
    x0 = x
    edge = adj_bias.astype(jnp.float32) > -1.0
    for i in range(timesteps):
        p = params["mp1"] if i % 2 == 0 else params["mp2"]
        h = x @ p["w"]
        a_src = jnp.sum(h * p["att_src"], axis=-1, keepdims=True)
        a_dst = jnp.sum(h * p["att_dst"], axis=-1, keepdims=True)
        logits = a_dst + a_src.T
        logits = jnp.where(logits >= 0, logits, 0.2 * logits)
        logits = jnp.where(edge, logits, _NEG)
        logits = logits - logits.max(-1, keepdims=True)
        pr = jnp.where(edge, jnp.exp(logits), 0.0)
        attn = pr / pr.sum(-1, keepdims=True)
        x = attn @ h + p["bias"]
    rp = params["readout"]
    gate = jax.nn.sigmoid(x0 @ rp["wg_i"] + x @ rp["wg_f"] + rp["bg"])
    nodewise = gate * (x @ rp["wt"] + rp["bt"])
    gx = graph_memb.astype(jnp.float32) @ nodewise
    h1 = jnp.maximum(gx @ rp["w1g"] + aux @ rp["w1a"] + rp["b1"], 0.0)
    h2 = jnp.maximum(h1 @ rp["w2"] + rp["b2"], 0.0)
    return h2 @ rp["w3"] + rp["b3"]


# ----------------------------------------------------------------------------
# Demo
# ----------------------------------------------------------------------------
if __name__ == "__main__":
    # Hyper-parameters of the module
    vocab_size = 32
    hidden_size = 32
    num_classes = 4
    output_dropout = 0.0            # eval-time no-op
    aux_features_dim = 2
    graph_x_layer_size = 32
    message_passing_timesteps = 2
    discretize_problem = True

    # Synthetic batch: 2 graphs, 64 nodes total
    num_nodes, num_graphs = 64, 2
    e_control, e_data, e_call = 96, 64, 16
    num_edges = e_control + e_data + e_call

    key = jax.random.PRNGKey(0)
    k_ids, k_edges, k_wg, k_tb, k_params = jax.random.split(key, 5)

    node_vocab_ids = jax.random.randint(k_ids, (num_nodes,), 0, vocab_size,
                                        dtype=jnp.int32)

    # unique non-self-loop edges, split into control/data/call
    pair_idx = jax.random.choice(k_edges, num_nodes * (num_nodes - 1),
                                 shape=(num_edges,), replace=False)
    src = (pair_idx // (num_nodes - 1)).astype(jnp.int32)
    rem = (pair_idx % (num_nodes - 1)).astype(jnp.int32)
    dst = rem + (rem >= src).astype(jnp.int32)
    control_edge_index = jnp.stack([src[:e_control], dst[:e_control]])
    data_edge_index = jnp.stack([src[e_control:e_control + e_data],
                                 dst[e_control:e_control + e_data]])
    call_edge_index = jnp.stack([src[e_control + e_data:],
                                 dst[e_control + e_data:]])
    # forward: edge_index = cat([control, data, call], dim=1)
    edge_index = jnp.concatenate(
        [control_edge_index, data_edge_index, call_edge_index], axis=1)

    graph_nodes_list = jnp.repeat(jnp.arange(num_graphs, dtype=jnp.int32),
                                  num_nodes // num_graphs)
    graph_memb = (graph_nodes_list[None, :]
                  == jnp.arange(num_graphs, dtype=jnp.int32)[:, None]
                  ).astype(jnp.float32)                                   # [G, N]

    wgsize_log1p = jax.random.uniform(k_wg, (num_graphs,), jnp.float32) * 5.0
    transfer_bytes_log1p = jax.random.uniform(k_tb, (num_graphs,), jnp.float32) * 10.0

    adj_bias = build_adjacency_bias(edge_index, num_nodes)

    params = init_params(k_params, vocab_size, hidden_size, num_classes,
                         aux_features_dim, graph_x_layer_size,
                         discretize_problem)

    logits = gat_load_balancing_forward(
        params, node_vocab_ids, adj_bias, graph_memb,
        wgsize_log1p, transfer_bytes_log1p,
        message_passing_timesteps=message_passing_timesteps)
    logits = jax.block_until_ready(logits)

    assert logits.shape == (num_graphs, num_classes)
    assert bool(jnp.all(jnp.isfinite(logits)))

    # correctness vs. fp32 pure-JAX reference (bf16 MXU + approx reciprocal
    # -> loosened tolerance)
    ref = reference_forward(params, node_vocab_ids, adj_bias, graph_memb,
                            wgsize_log1p, transfer_bytes_log1p,
                            message_passing_timesteps)
    assert bool(jnp.allclose(logits, ref, rtol=1e-1, atol=1e-1)), (
        f"max abs diff {float(jnp.max(jnp.abs(logits - ref)))}")

    print("KERNEL_OK")
</pallas_src>

<mosaic_0001>
module attributes {stable_mosaic.version = 11 : i64} {
  func.func @_fused_gat_kernel(%arg0: memref<64x32xf32, #tpu.memory_space<vmem>>, %arg1: memref<32x34xbf16, #tpu.memory_space<vmem>>, %arg2: memref<1x32xf32, #tpu.memory_space<vmem>>, %arg3: memref<32x34xbf16, #tpu.memory_space<vmem>>, %arg4: memref<1x32xf32, #tpu.memory_space<vmem>>, %arg5: memref<64x64xbf16, #tpu.memory_space<vmem>>, %arg6: memref<2x64xbf16, #tpu.memory_space<vmem>>, %arg7: memref<2x2xbf16, #tpu.memory_space<vmem>>, %arg8: memref<32x32xbf16, #tpu.memory_space<vmem>>, %arg9: memref<32x32xbf16, #tpu.memory_space<vmem>>, %arg10: memref<1x32xf32, #tpu.memory_space<vmem>>, %arg11: memref<32x32xbf16, #tpu.memory_space<vmem>>, %arg12: memref<1x32xf32, #tpu.memory_space<vmem>>, %arg13: memref<32x32xbf16, #tpu.memory_space<vmem>>, %arg14: memref<2x32xbf16, #tpu.memory_space<vmem>>, %arg15: memref<1x32xf32, #tpu.memory_space<vmem>>, %arg16: memref<32x32xbf16, #tpu.memory_space<vmem>>, %arg17: memref<1x32xf32, #tpu.memory_space<vmem>>, %arg18: memref<32x4xbf16, #tpu.memory_space<vmem>>, %arg19: memref<1x4xf32, #tpu.memory_space<vmem>>, %arg20: memref<2x4xf32, #tpu.memory_space<vmem>>, %arg21: memref<64x32xf32, #tpu.memory_space<vmem>>, %arg22: memref<64x1xf32, #tpu.memory_space<vmem>>) attributes {dimension_semantics = [], scalar_prefetch = 0 : i64, scratch_operands = 2 : i64, tpu.core_type = #tpu.core_type<tc>} {
    %c0 = arith.constant 0 : index
    %c0_0 = arith.constant 0 : index
    %0 = vector.load %arg0[%c0, %c0_0] : memref<64x32xf32, #tpu.memory_space<vmem>>, vector<64x32xf32>
    %1 = arith.truncf %0 : vector<64x32xf32> to vector<64x32xbf16>
    %c0_1 = arith.constant 0 : index
    %c0_2 = arith.constant 0 : index
    %2 = vector.load %arg1[%c0_1, %c0_2] : memref<32x34xbf16, #tpu.memory_space<vmem>>, vector<32x34xbf16>
    %cst = arith.constant dense<0.000000e+00> : vector<64x34xf32>
    %3 = tpu.matmul %1, %2, %cst {dimension_numbers = #tpu.dot_dimension_numbers<[1], [0], [0], [1], [0, 0, 1, 1], [], []>} : vector<64x32xbf16>, vector<32x34xbf16>, vector<64x34xf32> -> vector<64x34xf32>
    %4 = vector.extract_strided_slice %3 {offsets = [0, 0], sizes = [64, 32], strides = [1, 1]} : vector<64x34xf32> to vector<64x32xf32>
    %5 = arith.truncf %4 : vector<64x32xf32> to vector<64x32xbf16>
    %6 = vector.extract_strided_slice %3 {offsets = [0, 32], sizes = [64, 1], strides = [1, 1]} : vector<64x34xf32> to vector<64x1xf32>
    %c0_3 = arith.constant 0 : index
    %c0_4 = arith.constant 0 : index
    %7 = vector.load %arg22[%c0_3, %c0_4] : memref<64x1xf32, #tpu.memory_space<vmem>>, vector<64x1xf32>
    tpu.vector_store %arg22[%c0_3, %c0_4], %6 {strides = array<i32>} : memref<64x1xf32, #tpu.memory_space<vmem>>, vector<64x1xf32>,
    %8 = vector.extract_strided_slice %3 {offsets = [0, 33], sizes = [64, 1], strides = [1, 1]} : vector<64x34xf32> to vector<64x1xf32>
    %9 = tpu.transpose %8, [1, 0] : vector<64x1xf32> -> vector<1x64xf32>
    %c0_i32 = arith.constant 0 : i32
    %c64_i32 = arith.constant 64 : i32
    %10 = arith.muli %c0_i32, %c64_i32 : i32
    %11 = tpu.assume_multiple %10, 64 : i32
    %12 = arith.index_cast %11 : i32 to index
    %c0_5 = arith.constant 0 : index
    %13 = vector.load %arg22[%12, %c0_5] : memref<64x1xf32, #tpu.memory_space<vmem>>, vector<64x1xf32>
    %14 = arith.index_cast %11 : i32 to index
    %c0_6 = arith.constant 0 : index
    %15 = vector.load %arg5[%14, %c0_6] : memref<64x64xbf16, #tpu.memory_space<vmem>>, vector<64x64xbf16>
    %16 = arith.extf %15 : vector<64x64xbf16> to vector<64x64xf32>
    %17 = vector.broadcast %13 : vector<64x1xf32> to vector<64x64xf32>
    %18 = vector.broadcast %9 : vector<1x64xf32> to vector<64x64xf32>
    %19 = arith.addf %17, %18 : vector<64x64xf32>
    %cst_7 = arith.constant 2.000000e-01 : f32
    %20 = vector.broadcast %cst_7 : f32 to vector<64x64xf32>
    %21 = arith.mulf %20, %19 : vector<64x64xf32>
    %22 = arith.maximumf %19, %21 : vector<64x64xf32>
    %23 = arith.addf %22, %16 : vector<64x64xf32>
    %cst_8 = arith.constant dense<0xFF800000> : vector<64xf32>
    %24 = vector.multi_reduction <maximumf>, %23, %cst_8 [1] : vector<64x64xf32> to vector<64xf32>
    %25 = vector.shape_cast %24 : vector<64xf32> to vector<64x1xf32>
    %26 = vector.broadcast %25 : vector<64x1xf32> to vector<64x64xf32>
    %27 = arith.subf %23, %26 : vector<64x64xf32>
    %28 = math.exp %27 : vector<64x64xf32>
    %cst_9 = arith.constant dense<0.000000e+00> : vector<64xf32>
    %29 = vector.multi_reduction <add>, %28, %cst_9 [1] : vector<64x64xf32> to vector<64xf32>
    %30 = vector.shape_cast %29 : vector<64xf32> to vector<64x1xf32>
    %31 = tpu.reciprocal %30 {approx = true} : vector<64x1xf32> -> vector<64x1xf32>
    %32 = vector.broadcast %31 : vector<64x1xf32> to vector<64x64xf32>
    %33 = arith.mulf %28, %32 : vector<64x64xf32>
    %34 = arith.truncf %33 : vector<64x64xf32> to vector<64x64xbf16>
    %cst_10 = arith.constant dense<0.000000e+00> : vector<64x32xf32>
    %35 = tpu.matmul %34, %5, %cst_10 {dimension_numbers = #tpu.dot_dimension_numbers<[1], [0], [0], [1], [0, 0, 1, 1], [], []>} : vector<64x64xbf16>, vector<64x32xbf16>, vector<64x32xf32> -> vector<64x32xf32>
    %36 = arith.index_cast %11 : i32 to index
    %c0_11 = arith.constant 0 : index
    %37 = vector.load %arg21[%36, %c0_11] : memref<64x32xf32, #tpu.memory_space<vmem>>, vector<64x32xf32>
    tpu.vector_store %arg21[%36, %c0_11], %35 {strides = array<i32>} : memref<64x32xf32, #tpu.memory_space<vmem>>, vector<64x32xf32>,
    %c1_i32 = arith.constant 1 : i32
    %c0_12 = arith.constant 0 : index
    %c0_13 = arith.constant 0 : index
    %38 = vector.load %arg21[%c0_12, %c0_13] : memref<64x32xf32, #tpu.memory_space<vmem>>, vector<64x32xf32>
    %c0_14 = arith.constant 0 : index
    %c0_15 = arith.constant 0 : index
    %39 = vector.load %arg2[%c0_14, %c0_15] : memref<1x32xf32, #tpu.memory_space<vmem>>, vector<1x32xf32>
    %40 = vector.broadcast %39 : vector<1x32xf32> to vector<64x32xf32>
    %41 = arith.addf %38, %40 : vector<64x32xf32>
    %42 = arith.truncf %41 : vector<64x32xf32> to vector<64x32xbf16>
    %c0_16 = arith.constant 0 : index
    %c0_17 = arith.constant 0 : index
    %43 = vector.load %arg3[%c0_16, %c0_17] : memref<32x34xbf16, #tpu.memory_space<vmem>>, vector<32x34xbf16>
    %cst_18 = arith.constant dense<0.000000e+00> : vector<64x34xf32>
    %44 = tpu.matmul %42, %43, %cst_18 {dimension_numbers = #tpu.dot_dimension_numbers<[1], [0], [0], [1], [0, 0, 1, 1], [], []>} : vector<64x32xbf16>, vector<32x34xbf16>, vector<64x34xf32> -> vector<64x34xf32>
    %45 = vector.extract_strided_slice %44 {offsets = [0, 0], sizes = [64, 32], strides = [1, 1]} : vector<64x34xf32> to vector<64x32xf32>
    %46 = arith.truncf %45 : vector<64x32xf32> to vector<64x32xbf16>
    %47 = vector.extract_strided_slice %44 {offsets = [0, 32], sizes = [64, 1], strides = [1, 1]} : vector<64x34xf32> to vector<64x1xf32>
    %c0_19 = arith.constant 0 : index
    %c0_20 = arith.constant 0 : index
    %48 = vector.load %arg22[%c0_19, %c0_20] : memref<64x1xf32, #tpu.memory_space<vmem>>, vector<64x1xf32>
    tpu.vector_store %arg22[%c0_19, %c0_20], %47 {strides = array<i32>} : memref<64x1xf32, #tpu.memory_space<vmem>>, vector<64x1xf32>,
    %49 = vector.extract_strided_slice %44 {offsets = [0, 33], sizes = [64, 1], strides = [1, 1]} : vector<64x34xf32> to vector<64x1xf32>
    %50 = tpu.transpose %49, [1, 0] : vector<64x1xf32> -> vector<1x64xf32>
    %c0_i32_21 = arith.constant 0 : i32
    %c64_i32_22 = arith.constant 64 : i32
    %51 = arith.muli %c0_i32_21, %c64_i32_22 : i32
    %52 = tpu.assume_multiple %51, 64 : i32
    %53 = arith.index_cast %52 : i32 to index
    %c0_23 = arith.constant 0 : index
    %54 = vector.load %arg22[%53, %c0_23] : memref<64x1xf32, #tpu.memory_space<vmem>>, vector<64x1xf32>
    %55 = arith.index_cast %52 : i32 to index
    %c0_24 = arith.constant 0 : index
    %56 = vector.load %arg5[%55, %c0_24] : memref<64x64xbf16, #tpu.memory_space<vmem>>, vector<64x64xbf16>
    %57 = arith.extf %56 : vector<64x64xbf16> to vector<64x64xf32>
    %58 = vector.broadcast %54 : vector<64x1xf32> to vector<64x64xf32>
    %59 = vector.broadcast %50 : vector<1x64xf32> to vector<64x64xf32>
    %60 = arith.addf %58, %59 : vector<64x64xf32>
    %cst_25 = arith.constant 2.000000e-01 : f32
    %61 = vector.broadcast %cst_25 : f32 to vector<64x64xf32>
    %62 = arith.mulf %61, %60 : vector<64x64xf32>
    %63 = arith.maximumf %60, %62 : vector<64x64xf32>
    %64 = arith.addf %63, %57 : vector<64x64xf32>
    %cst_26 = arith.constant dense<0xFF800000> : vector<64xf32>
    %65 = vector.multi_reduction <maximumf>, %64, %cst_26 [1] : vector<64x64xf32> to vector<64xf32>
    %66 = vector.shape_cast %65 : vector<64xf32> to vector<64x1xf32>
    %67 = vector.broadcast %66 : vector<64x1xf32> to vector<64x64xf32>
    %68 = arith.subf %64, %67 : vector<64x64xf32>
    %69 = math.exp %68 : vector<64x64xf32>
    %cst_27 = arith.constant dense<0.000000e+00> : vector<64xf32>
    %70 = vector.multi_reduction <add>, %69, %cst_27 [1] : vector<64x64xf32> to vector<64xf32>
    %71 = vector.shape_cast %70 : vector<64xf32> to vector<64x1xf32>
    %72 = tpu.reciprocal %71 {approx = true} : vector<64x1xf32> -> vector<64x1xf32>
    %73 = vector.broadcast %72 : vector<64x1xf32> to vector<64x64xf32>
    %74 = arith.mulf %69, %73 : vector<64x64xf32>
    %75 = arith.truncf %74 : vector<64x64xf32> to vector<64x64xbf16>
    %cst_28 = arith.constant dense<0.000000e+00> : vector<64x32xf32>
    %76 = tpu.matmul %75, %46, %cst_28 {dimension_numbers = #tpu.dot_dimension_numbers<[1], [0], [0], [1], [0, 0, 1, 1], [], []>} : vector<64x64xbf16>, vector<64x32xbf16>, vector<64x32xf32> -> vector<64x32xf32>
    %77 = arith.index_cast %52 : i32 to index
    %c0_29 = arith.constant 0 : index
    %78 = vector.load %arg21[%77, %c0_29] : memref<64x32xf32, #tpu.memory_space<vmem>>, vector<64x32xf32>
    tpu.vector_store %arg21[%77, %c0_29], %76 {strides = array<i32>} : memref<64x32xf32, #tpu.memory_space<vmem>>, vector<64x32xf32>,
    %c1_i32_30 = arith.constant 1 : i32
    %c0_31 = arith.constant 0 : index
    %c0_32 = arith.constant 0 : index
    %79 = vector.load %arg21[%c0_31, %c0_32] : memref<64x32xf32, #tpu.memory_space<vmem>>, vector<64x32xf32>
    %c0_33 = arith.constant 0 : index
    %c0_34 = arith.constant 0 : index
    %80 = vector.load %arg4[%c0_33, %c0_34] : memref<1x32xf32, #tpu.memory_space<vmem>>, vector<1x32xf32>
    %81 = vector.broadcast %80 : vector<1x32xf32> to vector<64x32xf32>
    %82 = arith.addf %79, %81 : vector<64x32xf32>
    %83 = arith.truncf %0 : vector<64x32xf32> to vector<64x32xbf16>
    %84 = arith.truncf %82 : vector<64x32xf32> to vector<64x32xbf16>
    %c0_35 = arith.constant 0 : index
    %c0_36 = arith.constant 0 : index
    %85 = vector.load %arg8[%c0_35, %c0_36] : memref<32x32xbf16, #tpu.memory_space<vmem>>, vector<32x32xbf16>
    %cst_37 = arith.constant dense<0.000000e+00> : vector<64x32xf32>
    %86 = tpu.matmul %83, %85, %cst_37 {dimension_numbers = #tpu.dot_dimension_numbers<[1], [0], [0], [1], [0, 0, 1, 1], [], []>} : vector<64x32xbf16>, vector<32x32xbf16>, vector<64x32xf32> -> vector<64x32xf32>
    %c0_38 = arith.constant 0 : index
    %c0_39 = arith.constant 0 : index
    %87 = vector.load %arg9[%c0_38, %c0_39] : memref<32x32xbf16, #tpu.memory_space<vmem>>, vector<32x32xbf16>
    %cst_40 = arith.constant dense<0.000000e+00> : vector<64x32xf32>
    %88 = tpu.matmul %84, %87, %cst_40 {dimension_numbers = #tpu.dot_dimension_numbers<[1], [0], [0], [1], [0, 0, 1, 1], [], []>} : vector<64x32xbf16>, vector<32x32xbf16>, vector<64x32xf32> -> vector<64x32xf32>
    %89 = arith.addf %86, %88 : vector<64x32xf32>
    %c0_41 = arith.constant 0 : index
    %c0_42 = arith.constant 0 : index
    %90 = vector.load %arg10[%c0_41, %c0_42] : memref<1x32xf32, #tpu.memory_space<vmem>>, vector<1x32xf32>
    %91 = vector.broadcast %90 : vector<1x32xf32> to vector<64x32xf32>
    %92 = arith.addf %89, %91 : vector<64x32xf32>
    %93 = arith.negf %92 : vector<64x32xf32>
    %94 = math.exp %93 : vector<64x32xf32>
    %cst_43 = arith.constant 1.000000e+00 : f32
    %95 = vector.broadcast %cst_43 : f32 to vector<64x32xf32>
    %96 = arith.addf %95, %94 : vector<64x32xf32>
    %97 = arith.divf %95, %96 : vector<64x32xf32>
    %c0_44 = arith.constant 0 : index
    %c0_45 = arith.constant 0 : index
    %98 = vector.load %arg11[%c0_44, %c0_45] : memref<32x32xbf16, #tpu.memory_space<vmem>>, vector<32x32xbf16>
    %cst_46 = arith.constant dense<0.000000e+00> : vector<64x32xf32>
    %99 = tpu.matmul %84, %98, %cst_46 {dimension_numbers = #tpu.dot_dimension_numbers<[1], [0], [0], [1], [0, 0, 1, 1], [], []>} : vector<64x32xbf16>, vector<32x32xbf16>, vector<64x32xf32> -> vector<64x32xf32>
    %c0_47 = arith.constant 0 : index
    %c0_48 = arith.constant 0 : index
    %100 = vector.load %arg12[%c0_47, %c0_48] : memref<1x32xf32, #tpu.memory_space<vmem>>, vector<1x32xf32>
    %101 = vector.broadcast %100 : vector<1x32xf32> to vector<64x32xf32>
    %102 = arith.addf %99, %101 : vector<64x32xf32>
    %103 = arith.mulf %97, %102 : vector<64x32xf32>
    %104 = arith.truncf %103 : vector<64x32xf32> to vector<64x32xbf16>
    %c0_49 = arith.constant 0 : index
    %c0_50 = arith.constant 0 : index
    %105 = vector.load %arg6[%c0_49, %c0_50] : memref<2x64xbf16, #tpu.memory_space<vmem>>, vector<2x64xbf16>
    %cst_51 = arith.constant dense<0.000000e+00> : vector<2x32xf32>
    %106 = tpu.matmul %105, %104, %cst_51 {dimension_numbers = #tpu.dot_dimension_numbers<[1], [0], [0], [1], [0, 0, 1, 1], [], []>} : vector<2x64xbf16>, vector<64x32xbf16>, vector<2x32xf32> -> vector<2x32xf32>
    %107 = arith.truncf %106 : vector<2x32xf32> to vector<2x32xbf16>
    %c0_52 = arith.constant 0 : index
    %c0_53 = arith.constant 0 : index
    %108 = vector.load %arg13[%c0_52, %c0_53] : memref<32x32xbf16, #tpu.memory_space<vmem>>, vector<32x32xbf16>
    %cst_54 = arith.constant dense<0.000000e+00> : vector<2x32xf32>
    %109 = tpu.matmul %107, %108, %cst_54 {dimension_numbers = #tpu.dot_dimension_numbers<[1], [0], [0], [1], [0, 0, 1, 1], [], []>} : vector<2x32xbf16>, vector<32x32xbf16>, vector<2x32xf32> -> vector<2x32xf32>
    %c0_55 = arith.constant 0 : index
    %c0_56 = arith.constant 0 : index
    %110 = vector.load %arg7[%c0_55, %c0_56] : memref<2x2xbf16, #tpu.memory_space<vmem>>, vector<2x2xbf16>
    %c0_57 = arith.constant 0 : index
    %c0_58 = arith.constant 0 : index
    %111 = vector.load %arg14[%c0_57, %c0_58] : memref<2x32xbf16, #tpu.memory_space<vmem>>, vector<2x32xbf16>
    %cst_59 = arith.constant dense<0.000000e+00> : vector<2x32xf32>
    %112 = tpu.matmul %110, %111, %cst_59 {dimension_numbers = #tpu.dot_dimension_numbers<[1], [0], [0], [1], [0, 0, 1, 1], [], []>} : vector<2x2xbf16>, vector<2x32xbf16>, vector<2x32xf32> -> vector<2x32xf32>
    %113 = arith.addf %109, %112 : vector<2x32xf32>
    %c0_60 = arith.constant 0 : index
    %c0_61 = arith.constant 0 : index
    %114 = vector.load %arg15[%c0_60, %c0_61] : memref<1x32xf32, #tpu.memory_space<vmem>>, vector<1x32xf32>
    %115 = vector.broadcast %114 : vector<1x32xf32> to vector<2x32xf32>
    %116 = arith.addf %113, %115 : vector<2x32xf32>
    %cst_62 = arith.constant 0.000000e+00 : f32
    %117 = vector.broadcast %cst_62 : f32 to vector<2x32xf32>
    %118 = arith.maximumf %116, %117 : vector<2x32xf32>
    %119 = arith.truncf %118 : vector<2x32xf32> to vector<2x32xbf16>
    %c0_63 = arith.constant 0 : index
    %c0_64 = arith.constant 0 : index
    %120 = vector.load %arg16[%c0_63, %c0_64] : memref<32x32xbf16, #tpu.memory_space<vmem>>, vector<32x32xbf16>
    %cst_65 = arith.constant dense<0.000000e+00> : vector<2x32xf32>
    %121 = tpu.matmul %119, %120, %cst_65 {dimension_numbers = #tpu.dot_dimension_numbers<[1], [0], [0], [1], [0, 0, 1, 1], [], []>} : vector<2x32xbf16>, vector<32x32xbf16>, vector<2x32xf32> -> vector<2x32xf32>
    %c0_66 = arith.constant 0 : index
    %c0_67 = arith.constant 0 : index
    %122 = vector.load %arg17[%c0_66, %c0_67] : memref<1x32xf32, #tpu.memory_space<vmem>>, vector<1x32xf32>
    %123 = vector.broadcast %122 : vector<1x32xf32> to vector<2x32xf32>
    %124 = arith.addf %121, %123 : vector<2x32xf32>
    %cst_68 = arith.constant 0.000000e+00 : f32
    %125 = vector.broadcast %cst_68 : f32 to vector<2x32xf32>
    %126 = arith.maximumf %124, %125 : vector<2x32xf32>
    %127 = arith.truncf %126 : vector<2x32xf32> to vector<2x32xbf16>
    %c0_69 = arith.constant 0 : index
    %c0_70 = arith.constant 0 : index
    %128 = vector.load %arg18[%c0_69, %c0_70] : memref<32x4xbf16, #tpu.memory_space<vmem>>, vector<32x4xbf16>
    %cst_71 = arith.constant dense<0.000000e+00> : vector<2x4xf32>
    %129 = tpu.matmul %127, %128, %cst_71 {dimension_numbers = #tpu.dot_dimension_numbers<[1], [0], [0], [1], [0, 0, 1, 1], [], []>} : vector<2x32xbf16>, vector<32x4xbf16>, vector<2x4xf32> -> vector<2x4xf32>
    %c0_72 = arith.constant 0 : index
    %c0_73 = arith.constant 0 : index
    %130 = vector.load %arg19[%c0_72, %c0_73] : memref<1x4xf32, #tpu.memory_space<vmem>>, vector<1x4xf32>
    %131 = vector.broadcast %130 : vector<1x4xf32> to vector<2x4xf32>
    %132 = arith.addf %129, %131 : vector<2x4xf32>
    %c0_74 = arith.constant 0 : index
    %c0_75 = arith.constant 0 : index
    %133 = vector.load %arg20[%c0_74, %c0_75] : memref<2x4xf32, #tpu.memory_space<vmem>>, vector<2x4xf32>
    tpu.vector_store %arg20[%c0_74, %c0_75], %132 {strides = array<i32>} : memref<2x4xf32, #tpu.memory_space<vmem>>, vector<2x4xf32>,
    return
  }
}

</mosaic_0001>

<bundles_post_ra>
// kernel: gat_load_balancing_forward.1
= control target key start
LH: loop header
LB: loop body
LE: loop exit
PB: predicated region body
PF: predicated region fallthrough
CT: control target
= control target key end

     0   :  { %s2655_s0 = inlined_call_operand.vmem [shape: f32[64,32], index: 0, kind: input, shape index: {}]   ;;  %s2656_s1 = inlined_call_operand.vmem [shape: bf16[32,34], index: 1, kind: input, shape index: {}]   ;;  %s2657_s2 = inlined_call_operand.vmem [shape: f32[1,32], index: 2, kind: input, shape index: {}]   ;;  %s2658_s3 = inlined_call_operand.vmem [shape: bf16[32,34], index: 3, kind: input, shape index: {}]   ;;  %s2659_s4 = inlined_call_operand.vmem [shape: f32[1,32], index: 4, kind: input, shape index: {}]   ;;  %s2660_s5 = inlined_call_operand.vmem [shape: bf16[64,64], index: 5, kind: input, shape index: {}]   ;;  %s2661_s6 = inlined_call_operand.vmem [shape: bf16[2,64], index: 6, kind: input, shape index: {}]   ;;  %s2662_s7 = inlined_call_operand.vmem [shape: bf16[2,2], index: 7, kind: input, shape index: {}]   ;;  %s2663_s8 = inlined_call_operand.vmem [shape: bf16[32,32], index: 8, kind: input, shape index: {}]   ;;  %s2664_s9 = inlined_call_operand.vmem [shape: bf16[32,32], index: 9, kind: input, shape index: {}]   ;;  %s2665_s10 = inlined_call_operand.vmem [shape: f32[1,32], index: 10, kind: input, shape index: {}]   ;;  %s2666_s11 = inlined_call_operand.vmem [shape: bf16[32,32], index: 11, kind: input, shape index: {}]   ;;  %s2667_s12 = inlined_call_operand.vmem [shape: f32[1,32], index: 12, kind: input, shape index: {}]   ;;  %s2668_s13 = inlined_call_operand.vmem [shape: bf16[32,32], index: 13, kind: input, shape index: {}]   ;;  %s2669_s14 = inlined_call_operand.vmem [shape: bf16[2,32], index: 14, kind: input, shape index: {}]   ;;  %s2670_s15 = inlined_call_operand.vmem [shape: f32[1,32], index: 15, kind: input, shape index: {}]   ;;  %s2671_s16 = inlined_call_operand.vmem [shape: bf16[32,32], index: 16, kind: input, shape index: {}]   ;;  %s2672_s17 = inlined_call_operand.vmem [shape: f32[1,32], index: 17, kind: input, shape index: {}]   ;;  %s2673_s18 = inlined_call_operand.vmem [shape: bf16[32,4], index: 18, kind: input, shape index: {}]   ;;  %s2674_s19 = inlined_call_operand.vmem [shape: f32[1,4], index: 19, kind: input, shape index: {}]   ;;  %s2675_s20 = inlined_call_operand.hbm [shape: f32[2,4], index: 20, kind: output, shape index: {}]  }
   0x1   :  { %2679 = sst [smem:[#allocation7_spill]] %s2655_s0 }
   0x2   :  { %2680 = sst [smem:[#allocation8_spill]] %s2656_s1 }
   0x3   :  { %2681 = sst [smem:[#allocation9_spill]] %s2657_s2 }
   0x4   :  { %2682 = sst [smem:[#allocation10_spill]] %s2658_s3 }
   0x5   :  { %2683 = sst [smem:[#allocation11_spill]] %s2659_s4 }
   0x6   :  { %s2684_s23 = sld [smem:[#allocation8_spill]]  ;;  %s2685_s26 = sld [smem:[#allocation7_spill]]  ;;  %vm95_vm0 = vcmask 261120  }
   0xc   :  { %v2041_v0 = vld [vmem:[%s2684_s23] sm:$0xff]   ;;  %v2042_v1 = vld [vmem:[%s2684_s23 + $0x8] sm:$0xff]   ;;  %v69_v5 = vld [vmem:[%s2685_s26 + $0x10] sm:$0xff] }
   0xd   :  { %1891 = vmatprep.subr.bf16.mxu0 %v2041_v0  ;;  %v67_v2 = vld [vmem:[%s2685_s26] sm:$0xff]  ;;  %v68_v3 = vld [vmem:[%s2685_s26 + $0x8] sm:$0xff]  ;;  %v70_v6 = vld [vmem:[%s2685_s26 + $0x18] sm:$0xff] }
   0xe   :  { %1892 = vmatpush3.bf16.msra.mxu0 %v2041_v0  ;;  %v2300_v4 = vpack.c.bf16 %v68_v3, %v67_v2  ;;  %v71_v7 = vld [vmem:[%s2685_s26 + $0x20] sm:$0xff]  ;;  %v72_v8 = vld [vmem:[%s2685_s26 + $0x28] sm:$0xff]  ;;  %v2316_v9 = vpack.c.bf16 %v70_v6, %v69_v5  ;;  %v73_v11 = vld [vmem:[%s2685_s26 + $0x30] sm:$0xff] }
   0xf   :  { %1893 = vmatprep.subr.bf16.mxu0 %v2042_v1  ;;  %v2318_v10 = vpack.c.bf16 %v72_v8, %v71_v7  ;;  %v74_v12 = vld [vmem:[%s2685_s26 + $0x38] sm:$0xff] }
  0x10   :  { %1895 = vmatprep.mubr.msk.bf16.mxu0 %vm95_vm0, %v2300_v4  ;;  %v2330_v13 = vpack.c.bf16 %v74_v12, %v73_v11 }
  0x12   :  { %1894 = vmatpush3.bf16.msra.mxu0 %v2042_v1 }
  0x15   :  { %1896 = vmatmul.mubr.msk.bf16.vlgmr.msra.gmra.mrb[0].mxu0 %vm95_vm0, %v2316_v9 }
  0x16   :  { %1899 = vmatprep.mubr.msk.bf16.mxu0 %vm95_vm0, %v2318_v10 }
  0x17   :  { %25 = vsyncpa [#allocation5], 0  ;;  %v2177_v14 = vmov 0   ;;  %s2178_s27 = smov 96   ;;  %s2179_s26 = smov 95   ;;  %vm209_vm1 = vcmask 7168   ;;  %v338_v53 = vlaneseq }
  0x18   :  { %2039 = vset.pattern.permute.xlu1 %v2177_v14  ;;  %2040 = vset.pattern.permute.xlu0 %v2177_v14  ;;  %v2366_v62 = vld [vmem:[%s2660_s5 + $0x8] sm:$0xff]   ;;  %v2371_v0 = vld [vmem:[%s2660_s5] sm:$0xff]   ;;  %vm374_vm2 = vcmask 523264   ;;  %s2686_s24 = sld [smem:[#allocation10_spill]]  ;;  %s2687_s4 = sld [smem:[#allocation9_spill]]  ;;  %vm2181_vm3 = vmmov 0  }
  0x19   :  { %v2358_v55 = vshrl.u32 %v338_v53, 7  ;;  %v1797_v3 = vunpack.c.l.bf16 %v2366_v62  ;;  %v1793_v7 = vunpack.c.l.bf16 %v2371_v0  ;;  %vm1468_vm4 = vcmask 1040384   ;;  %s2182_s3 = smov [#allocation4]  }
  0x1a   :  { %vm1464_vm5 = vcmask 15360   ;;  %vm1711_vm6 = vcmask 25600  }
  0x1b   :  { %v340_v58 = vsub.s32 0, %v2358_v55 }
  0x1d   :  { %1900 = vmatmul.mubr.msk.bf16.gmra.mrb[4].mxu0 %vm95_vm0, %v2330_v13 }
  0xe8   :  { %v1897_v15 = vpop.f32.mrb[0].mxu0 }
  0xe9   :  { %189 = vrot.lane.b32.xlu1 %v1897_v15, %s2178_s27  ;;  %v142_v16 = vpop.f32.mrb[1].mxu0 }
  0xea   :  { %185 = vrot.lane.b32.xlu0 %v142_v16, %s2178_s27  ;;  %v1898_v17 = vpop.f32.mrb[2].mxu0 }
  0xeb   :  { %v174_v18 = vpack.c.bf16 %v1898_v17, %v1897_v15  ;;  %v145_v19 = vpop.f32.mrb[3].mxu0 }
  0xec   :  { %v173_v20 = vpack.c.bf16 %v145_v19, %v142_v16 }
  0xed   :  { %191 = vrot.lane.b32.xlu1 %v1898_v17, %s2178_s27 }
  0xee   :  { %187 = vrot.lane.b32.xlu0 %v145_v19, %s2178_s27  ;;  %1903 = vmatprep.subr.bf16.mxu1 %v173_v20 }
  0xef   :  { %1904 = vmatpush3.bf16.msra.mxu1 %v173_v20 }
  0xf0   :  { %v1901_v21 = vpop.f32.mrb[4].mxu0  ;;  %1905 = vmatprep.subr.bf16.mxu1 %v174_v18 }
  0xf1   :  { %220 = vrot.lane.b32.xlu1 %v145_v19, %s2179_s26  ;;  %v158_v22 = vpop.f32.mrb[5].mxu0 }
  0xf2   :  { %193 = vrot.lane.b32.xlu0 %v158_v22, %s2178_s27  ;;  %v1902_v23 = vpop.f32.mrb[6].mxu0 }
  0xf3   :  { %v176_v24 = vpack.c.bf16 %v1902_v23, %v1901_v21  ;;  %v161_v25 = vpop.f32.mrb[7].mxu0  ;;  %1906 = vmatpush3.bf16.msra.mxu1 %v174_v18 }
  0xf4   :  { %v175_v26 = vpack.c.bf16 %v161_v25, %v158_v22 }
  0xf5   :  { %224 = vrot.lane.b32.xlu1 %v1898_v17, %s2179_s26 }
  0xf6   :  { %197 = vrot.lane.b32.xlu0 %v1901_v21, %s2178_s27  ;;  %1907 = vmatprep.subr.bf16.mxu1 %v175_v26 }
  0xf7   :  { %1908 = vmatpush3.bf16.msra.mxu1 %v175_v26 }
  0xf8   :  { %1909 = vmatprep.subr.bf16.mxu1 %v176_v24 }
  0xf9   :  { %199 = vrot.lane.b32.xlu1 %v1902_v23, %s2178_s27 }
  0xfa   :  { %218 = vrot.lane.b32.xlu0 %v142_v16, %s2179_s26  ;;  %v1798_v16 = vunpack.c.h.bf16 %v2366_v62 }
  0xfb   :  { %1910 = vmatpush3.bf16.msra.mxu1 %v176_v24 }
  0xfd   :  { %232 = vrot.lane.b32.xlu1 %v1902_v23, %s2179_s26 }
  0xfe   :  { %222 = vrot.lane.b32.xlu0 %v1897_v15, %s2179_s26 }
 0x101   :  { %195 = vrot.lane.b32.xlu1 %v161_v25, %s2178_s27 }
 0x102   :  { %226 = vrot.lane.b32.xlu0 %v158_v22, %s2179_s26  ;;  %v1794_v22 = vunpack.c.h.bf16 %v2371_v0 }
 0x105   :  { %228 = vrot.lane.b32.xlu1 %v161_v25, %s2179_s26 }
 0x106   :  { %230 = vrot.lane.b32.xlu0 %v1901_v21, %s2179_s26 }
 0x15b   :  { %v190_v27 = vpop.permute.xlu1 %189 }
 0x15c   :  { %212 = vst.msk [vmem:[#allocation3 + $0x10] sm:$0xff] %vm209_vm1, %v190_v27  ;;  %v186_v28 = vpop.permute.xlu0 %185 }
 0x15d   :  { %210 = vst.msk [vmem:[#allocation3] sm:$0xff] %vm209_vm1, %v186_v28  ;;  %v2388_v28 = vld [vmem:[%s2660_s5 + $0x18] sm:$0xff]  }
 0x15f   :  { %v192_v29 = vpop.permute.xlu1 %191 }
 0x160   :  { %213 = vst.msk [vmem:[#allocation3 + $0x18] sm:$0xff] %vm209_vm1, %v192_v29  ;;  %v188_v30 = vpop.permute.xlu0 %187 }
 0x161   :  { %211 = vst.msk [vmem:[#allocation3 + $0x8] sm:$0xff] %vm209_vm1, %v188_v30  ;;  %v1805_v30 = vunpack.c.l.bf16 %v2388_v28 }
 0x163   :  { %v221_v31 = vpop.permute.xlu1 %220  ;;  %v276_v32 = vld [vmem:[#allocation3 + $0x10] sm:$0xff] }
 0x164   :  { %v194_v33 = vpop.permute.xlu0 %193  ;;  %310 = vperm.xlu1 %2039, %v276_v32   ;;  %v274_v34 = vld [vmem:[#allocation3] sm:$0xff] }
 0x165   :  { %214 = vst.msk [vmem:[#allocation3 + $0x20] sm:$0xff] %vm209_vm1, %v194_v33  ;;  %300 = vperm.xlu0 %2040, %v274_v34  }
 0x167   :  { %v225_v35 = vpop.permute.xlu1 %224  ;;  %v277_v36 = vld [vmem:[#allocation3 + $0x18] sm:$0xff] }
 0x168   :  { %v198_v37 = vpop.permute.xlu0 %197  ;;  %v275_v38 = vld [vmem:[#allocation3 + $0x8] sm:$0xff] }
 0x169   :  { %216 = vst.msk [vmem:[#allocation3 + $0x30] sm:$0xff] %vm209_vm1, %v198_v37  ;;  %315 = vperm.xlu0 %2040, %v277_v36   ;;  %305 = vperm.xlu1 %2039, %v275_v38  }
 0x16b   :  { %v200_v39 = vpop.permute.xlu1 %199 }
 0x16c   :  { %217 = vst.msk [vmem:[#allocation3 + $0x38] sm:$0xff] %vm209_vm1, %v200_v39  ;;  %v278_v43 = vld [vmem:[#allocation3 + $0x20] sm:$0xff]  ;;  %v219_v46 = vpop.permute.xlu0 %218 }
 0x16f   :  { %v233_v40 = vpop.permute.xlu1 %232 }
 0x170   :  { %v280_v41 = vld [vmem:[#allocation3 + $0x30] sm:$0xff]  ;;  %v223_v47 = vpop.permute.xlu0 %222 }
 0x171   :  { %330 = vperm.xlu1 %2039, %v280_v41  }
 0x173   :  { %v196_v42 = vpop.permute.xlu1 %195  ;;  %v281_v45 = vld [vmem:[#allocation3 + $0x38] sm:$0xff] }
 0x174   :  { %215 = vst.msk [vmem:[#allocation3 + $0x28] sm:$0xff] %vm209_vm1, %v196_v42  ;;  %v227_v48 = vpop.permute.xlu0 %226 }
 0x175   :  { %320 = vperm.xlu1 %2039, %v278_v43  }
 0x177   :  { %v229_v49 = vpop.permute.xlu1 %228 }
 0x178   :  { %v231_v50 = vpop.permute.xlu0 %230 }
 0x17b   :  { %v279_v44 = vld [vmem:[#allocation3 + $0x28] sm:$0xff] }
 0x17c   :  { %325 = vperm.xlu0 %2040, %v279_v44  }
 0x180   :  { %335 = vperm.xlu0 %2040, %v281_v45  }
 0x19e   :  { %242 = vxpose.xlu1.b32.start [1/8] (short) (narrow) %v219_v46, 8 }
 0x1a2   :  { %243 = vxpose.xlu1.b32.cont [2/8] (short) (narrow) %v221_v31, 8 }
 0x1a6   :  { %244 = vxpose.xlu1.b32.cont [3/8] (short) (narrow) %v223_v47, 8 }
 0x1aa   :  { %245 = vxpose.xlu1.b32.cont [4/8] (short) (narrow) %v225_v35, 8  ;;  %v2397_v35 = vld [vmem:[%s2660_s5 + $0x10] sm:$0xff]  }
 0x1ab   :  { %v1801_v38 = vunpack.c.l.bf16 %v2397_v35  ;;  %v1802_v44 = vunpack.c.h.bf16 %v2397_v35 }
 0x1ae   :  { %246 = vxpose.xlu1.b32.cont [5/8] (short) (narrow) %v227_v48, 8 }
 0x1b2   :  { %247 = vxpose.xlu1.b32.cont [6/8] (short) (narrow) %v229_v49, 8 }
 0x1b6   :  { %248 = vxpose.xlu1.b32.cont [7/8] (short) (narrow) %v231_v50, 8 }
 0x1ba   :  { %249 = vxpose.xlu1.b32.end [8/8] (short) (narrow) %v233_v40, 8 }
 0x1e3   :  { %v311_v51 = vpop.permute.xlu1 %310 }
 0x1e4   :  { %v301_v56 = vpop.permute.xlu0 %300 }
 0x1e8   :  { %v306_v52 = vpop.permute.xlu1 %305  ;;  %v316_v61 = vpop.permute.xlu0 %315 }
 0x1f0   :  { %v331_v54 = vpop.permute.xlu1 %330 }
 0x1f4   :  { %v321_v57 = vpop.permute.xlu1 %320 }
 0x1fb   :  { %v326_v24 = vpop.permute.xlu0 %325 }
 0x1ff   :  { %v336_v37 = vpop.permute.xlu0 %335 }
 0x21e   :  { %v258_v59 = vpop.trf.xlu1 }
 0x21f   :  { %v341_v60 = vrot.slane %v258_v59, %v340_v58 }
 0x221   :  { %v344_v63 = vadd.f32 %v341_v60, %v311_v51  ;;  %v342_v1 = vadd.f32 %v341_v60, %v301_v56  ;;  %v345_v2 = vadd.f32 %v341_v60, %v316_v61  ;;  %v343_v14 = vadd.f32 %v341_v60, %v306_v52 }
 0x222   :  { %v348_v17 = vadd.f32 %v341_v60, %v331_v54  ;;  %v346_v23 = vadd.f32 %v341_v60, %v321_v57  ;;  %v347_v31 = vadd.f32 %v341_v60, %v326_v24  ;;  %v349_v39 = vadd.f32 %v341_v60, %v336_v37 }
 0x223   :  { %v352_v5 = vmul.f32 0.2, %v344_v63  ;;  %v350_v6 = vmul.f32 0.2, %v342_v1  ;;  %v353_v12 = vmul.f32 0.2, %v345_v2  ;;  %v1806_v51 = vunpack.c.h.bf16 %v2388_v28 }
 0x224   :  { %v351_v21 = vmul.f32 0.2, %v343_v14  ;;  %v356_v29 = vmul.f32 0.2, %v348_v17  ;;  %v354_v36 = vmul.f32 0.2, %v346_v23 }
 0x225   :  { %v360_v8 = vmax.f32 %v344_v63, %v352_v5  ;;  %v358_v11 = vmax.f32 %v342_v1, %v350_v6  ;;  %v361_v20 = vmax.f32 %v345_v2, %v353_v12  ;;  %v355_v43 = vmul.f32 0.2, %v347_v31 }
 0x226   :  { %v359_v27 = vmax.f32 %v343_v14, %v351_v21  ;;  %v364_v34 = vmax.f32 %v348_v17, %v356_v29  ;;  %v362_v42 = vmax.f32 %v346_v23, %v354_v36  ;;  %v357_v48 = vmul.f32 0.2, %v349_v39 }
 0x227   :  { %v368_v15 = vadd.f32 %v1797_v3, %v360_v8  ;;  %v366_v19 = vadd.f32 %v1793_v7, %v358_v11  ;;  %v369_v26 = vadd.f32 %v1798_v16, %v361_v20  ;;  %v363_v47 = vmax.f32 %v347_v31, %v355_v43 }
 0x228   :  { %v367_v33 = vadd.f32 %v1794_v22, %v359_v27  ;;  %v372_v41 = vadd.f32 %v1805_v30, %v364_v34  ;;  %v370_v46 = vadd.f32 %v1801_v38, %v362_v42  ;;  %v365_v52 = vmax.f32 %v349_v39, %v357_v48 }
 0x229   :  { %v381_v18 = vsel %vm374_vm2, %v368_v15, -inf  ;;  %v375_v25 = vsel %vm374_vm2, %v366_v19, -inf  ;;  %v384_v32 = vsel %vm374_vm2, %v369_v26, -inf  ;;  %v371_v50 = vadd.f32 %v1802_v44, %v363_v47 }
 0x22a   :  { %382 = vmax.xlane.f32.xlu0 %v381_v18  ;;  %v378_v40 = vsel %vm374_vm2, %v367_v33, -inf  ;;  %v393_v45 = vsel %vm374_vm2, %v372_v41, -inf  ;;  %v387_v49 = vsel %vm374_vm2, %v370_v46, -inf  ;;  %v373_v54 = vadd.f32 %v1806_v51, %v365_v52 }
 0x22b   :  { %v390_v53 = vsel %vm374_vm2, %v371_v50, -inf }
 0x22c   :  { %v396_v56 = vsel %vm374_vm2, %v373_v54, -inf }
 0x22e   :  { %376 = vmax.xlane.f32.xlu0 %v375_v25 }
 0x232   :  { %385 = vmax.xlane.f32.xlu0 %v384_v32 }
 0x236   :  { %379 = vmax.xlane.f32.xlu0 %v378_v40 }
 0x23a   :  { %394 = vmax.xlane.f32.xlu0 %v393_v45 }
 0x23e   :  { %388 = vmax.xlane.f32.xlu0 %v387_v49 }
 0x242   :  { %391 = vmax.xlane.f32.xlu0 %v390_v53 }
 0x246   :  { %397 = vmax.xlane.f32.xlu0 %v396_v56 }
 0x2b7   :  { %v383_v57 = vpop.xlane.xlu0 %382 }
 0x2b8   :  { %v401_v59 = vsub.f32 %v368_v15, %v383_v57 }
 0x2ba   :  { %v411_v60 = vmul.f32 1.442695, %v401_v59 }
 0x2bb   :  { %v377_v61 = vpop.xlane.xlu0 %376 }
 0x2bc   :  { %2057 = vpow2.f32 %v411_v60  ;;  %v399_v63 = vsub.f32 %v366_v19, %v377_v61 }
 0x2be   :  { %v407_v1 = vmul.f32 1.442695, %v399_v63 }
 0x2bf   :  { %v386_v2 = vpop.xlane.xlu0 %385 }
 0x2c0   :  { %2059 = vpow2.f32 %v407_v1  ;;  %v402_v5 = vsub.f32 %v369_v26, %v386_v2 }
 0x2c2   :  { %v413_v6 = vmul.f32 1.442695, %v402_v5 }
 0x2c3   :  { %v380_v8 = vpop.xlane.xlu0 %379 }
 0x2c4   :  { %2061 = vpow2.f32 %v413_v6  ;;  %v400_v11 = vsub.f32 %v367_v33, %v380_v8 }
 0x2c6   :  { %v2058_v12 = vpop.eup %2057  ;;  %v409_v14 = vmul.f32 1.442695, %v400_v11 }
 0x2c7   :  { %v395_v17 = vpop.xlane.xlu0 %394  ;;  %v429_v18 = vsel %vm374_vm2, %v2058_v12, 0.0 }
 0x2c8   :  { %2063 = vpow2.f32 %v409_v14  ;;  %v405_v20 = vsub.f32 %v372_v41, %v395_v17  ;;  %430 = vadd.xlane.f32.xlu1 %v429_v18 }
 0x2ca   :  { %v2060_v15 = vpop.eup %2059  ;;  %v419_v21 = vmul.f32 1.442695, %v405_v20 }
 0x2cb   :  { %v389_v23 = vpop.xlane.xlu0 %388  ;;  %v423_v19 = vsel %vm374_vm2, %v2060_v15, 0.0 }
 0x2cc   :  { %2065 = vpow2.f32 %v419_v21  ;;  %v403_v24 = vsub.f32 %v370_v46, %v389_v23  ;;  %424 = vadd.xlane.f32.xlu0 %v423_v19 }
 0x2ce   :  { %v2062_v25 = vpop.eup %2061  ;;  %v415_v26 = vmul.f32 1.442695, %v403_v24 }
 0x2cf   :  { %v392_v27 = vpop.xlane.xlu0 %391  ;;  %v432_v29 = vsel %vm374_vm2, %v2062_v25, 0.0 }
 0x2d0   :  { %2067 = vpow2.f32 %v415_v26  ;;  %v404_v31 = vsub.f32 %v371_v50, %v392_v27  ;;  %433 = vadd.xlane.f32.xlu0 %v432_v29  ;;  %v2043_v26 = vld [vmem:[%s2686_s24] sm:$0xff]   ;;  %v2044_v27 = vld [vmem:[%s2686_s24 + $0x8] sm:$0xff]   ;;  %s2688_s24 = sld [smem:[#allocation11_spill]] }
 0x2d1   :  { %1919 = vmatprep.subr.bf16.mxu0 %v2043_v26 }
 0x2d2   :  { %v2064_v32 = vpop.eup %2063  ;;  %v417_v33 = vmul.f32 1.442695, %v404_v31  ;;  %1920 = vmatpush3.bf16.msra.mxu0 %v2043_v26 }
 0x2d3   :  { %v398_v34 = vpop.xlane.xlu0 %397  ;;  %v426_v36 = vsel %vm374_vm2, %v2064_v32, 0.0  ;;  %1921 = vmatprep.subr.bf16.mxu0 %v2044_v27 }
 0x2d4   :  { %2069 = vpow2.f32 %v417_v33  ;;  %v406_v37 = vsub.f32 %v373_v54, %v398_v34  ;;  %427 = vadd.xlane.f32.xlu0 %v426_v36  ;;  %v1737_v36 = vld [vmem:[%s2687_s4] ss:$0 sm:$0xff] }
 0x2d6   :  { %v2066_v39 = vpop.eup %2065  ;;  %v421_v40 = vmul.f32 1.442695, %v406_v37  ;;  %1922 = vmatpush3.bf16.msra.mxu0 %v2044_v27 }
 0x2d7   :  { %v441_v41 = vsel %vm374_vm2, %v2066_v39, 0.0 }
 0x2d8   :  { %2071 = vpow2.f32 %v421_v40  ;;  %442 = vadd.xlane.f32.xlu0 %v441_v41 }
 0x2da   :  { %v2068_v42 = vpop.eup %2067 }
 0x2db   :  { %v435_v43 = vsel %vm374_vm2, %v2068_v42, 0.0 }
 0x2dc   :  { %436 = vadd.xlane.f32.xlu0 %v435_v43 }
 0x2de   :  { %v2070_v45 = vpop.eup %2069 }
 0x2df   :  { %v438_v46 = vsel %vm374_vm2, %v2070_v45, 0.0 }
 0x2e0   :  { %439 = vadd.xlane.f32.xlu0 %v438_v46 }
 0x2e2   :  { %v2072_v47 = vpop.eup %2071 }
 0x2e3   :  { %v444_v48 = vsel %vm374_vm2, %v2072_v47, 0.0 }
 0x2e4   :  { %445 = vadd.xlane.f32.xlu0 %v444_v48 }
 0x355   :  { %v431_v52 = vpop.xlane.xlu1 %430 }
 0x359   :  { %v425_v49 = vpop.xlane.xlu0 %424 }
 0x35d   :  { %v434_v50 = vpop.xlane.xlu0 %433 }
 0x35e   :  { %2073 = vrcp.f32 %v434_v50 }
 0x35f   :  { %2075 = vrcp.f32 %v425_v49 }
 0x360   :  { %2077 = vrcp.f32 %v431_v52 }
 0x361   :  { %v428_v53 = vpop.xlane.xlu0 %427 }
 0x362   :  { %2079 = vrcp.f32 %v428_v53 }
 0x365   :  { %v443_v54 = vpop.xlane.xlu0 %442 }
 0x368   :  { %v2074_v56 = vpop.eup %2073 }
 0x369   :  { %v437_v57 = vpop.xlane.xlu0 %436  ;;  %v2076_v59 = vpop.eup %2075  ;;  %v458_v63 = vmul.f32 %v2074_v56, %v2062_v25 }
 0x36a   :  { %v2078_v60 = vpop.eup %2077  ;;  %2081 = vrcp.f32 %v437_v57  ;;  %v455_v2 = vmul.f32 %v2076_v59, %v2060_v15 }
 0x36b   :  { %v457_v6 = vmul.f32 %v2078_v60, %v2058_v12 }
 0x36c   :  { %v2080_v61 = vpop.eup %2079 }
 0x36d   :  { %v440_v1 = vpop.xlane.xlu0 %439  ;;  %v456_v5 = vmul.f32 %v2080_v61, %v2064_v32  ;;  %v464_v11 = vpack.c.bf16 %v458_v63, %v457_v6 }
 0x36e   :  { %2083 = vrcp.f32 %v440_v1 }
 0x36f   :  { %v463_v8 = vpack.c.bf16 %v456_v5, %v455_v2  ;;  %2085 = vrcp.f32 %v443_v54 }
 0x371   :  { %1911 = vmatprep.mubr.msk.bf16.mxu1 %vm374_vm2, %v463_v8  ;;  %v446_v14 = vpop.xlane.xlu0 %445 }
 0x372   :  { %2087 = vrcp.f32 %v446_v14  ;;  %1912 = vmatmul.mubr.msk.bf16.vlgmr.msra.gmra.mrb[0].mxu1 %vm374_vm2, %v464_v11 }
 0x374   :  { %v2082_v17 = vpop.eup %2081 }
 0x375   :  { %v459_v20 = vmul.f32 %v2082_v17, %v2068_v42 }
 0x378   :  { %v2084_v18 = vpop.eup %2083 }
 0x379   :  { %v460_v21 = vmul.f32 %v2084_v18, %v2070_v45  ;;  %v2086_v23 = vpop.eup %2085 }
 0x37a   :  { %v461_v15 = vmul.f32 %v2086_v23, %v2066_v39 }
 0x37b   :  { %v465_v19 = vpack.c.bf16 %v460_v21, %v459_v20 }
 0x37c   :  { %v2088_v24 = vpop.eup %2087 }
 0x37d   :  { %1915 = vmatprep.mubr.msk.bf16.mxu1 %vm374_vm2, %v465_v19  ;;  %v462_v12 = vmul.f32 %v2088_v24, %v2072_v47 }
 0x37f   :  { %v466_v25 = vpack.c.bf16 %v462_v12, %v461_v15 }
 0x381   :  { %1916 = vmatmul.mubr.msk.bf16.gmra.mrb[4].mxu1 %vm374_vm2, %v466_v25 }
 0x445   :  { %v1913_v29 = vpop.f32.mrb[0].mxu1 }
 0x446   :  { %546 = vst.msk [vmem:[#allocation2 + $0x10] sm:$0xff] %vm95_vm0, %v1913_v29  ;;  %v513_v31 = vpop.f32.mrb[1].mxu1 }
 0x447   :  { %544 = vst.msk [vmem:[#allocation2] sm:$0xff] %vm95_vm0, %v513_v31  ;;  %v1914_v32 = vpop.f32.mrb[2].mxu1 }
 0x448   :  { %547 = vst.msk [vmem:[#allocation2 + $0x18] sm:$0xff] %vm95_vm0, %v1914_v32  ;;  %v516_v33 = vpop.f32.mrb[3].mxu1 }
 0x449   :  { %545 = vst.msk [vmem:[#allocation2 + $0x8] sm:$0xff] %vm95_vm0, %v516_v33 }
 0x44d   :  { %v554_v37 = vld [vmem:[#allocation2 + $0x10] sm:$0xff] }
 0x44e   :  { %v552_v34 = vld [vmem:[#allocation2] sm:$0xff]  ;;  %v569_v45 = vadd.f32 %v1737_v36, %v554_v37 }
 0x44f   :  { %v555_v39 = vld [vmem:[#allocation2 + $0x18] sm:$0xff]  ;;  %v567_v42 = vadd.f32 %v1737_v36, %v552_v34 }
 0x450   :  { %v553_v40 = vld [vmem:[#allocation2 + $0x8] sm:$0xff]  ;;  %v570_v41 = vadd.f32 %v1737_v36, %v555_v39 }
 0x451   :  { %v568_v43 = vadd.f32 %v1737_v36, %v553_v40 }
 0x452   :  { %v576_v48 = vpack.c.bf16 %v570_v41, %v569_v45 }
 0x453   :  { %v575_v46 = vpack.c.bf16 %v568_v43, %v567_v42 }
 0x454   :  { %v1917_v47 = vpop.f32.mrb[4].mxu1 }
 0x455   :  { %550 = vst.msk [vmem:[#allocation2 + $0x30] sm:$0xff] %vm95_vm0, %v1917_v47  ;;  %v529_v49 = vpop.f32.mrb[5].mxu1  ;;  %1923 = vmatprep.mubr.msk.bf16.mxu0 %vm95_vm0, %v575_v46 }
 0x456   :  { %548 = vst.msk [vmem:[#allocation2 + $0x20] sm:$0xff] %vm95_vm0, %v529_v49  ;;  %v1918_v50 = vpop.f32.mrb[6].mxu1  ;;  %1924 = vmatmul.mubr.msk.bf16.vlgmr.msra.gmra.mrb[8].mxu0 %vm95_vm0, %v576_v48 }
 0x457   :  { %551 = vst.msk [vmem:[#allocation2 + $0x38] sm:$0xff] %vm95_vm0, %v1918_v50  ;;  %v532_v52 = vpop.f32.mrb[7].mxu1 }
 0x458   :  { %549 = vst.msk [vmem:[#allocation2 + $0x28] sm:$0xff] %vm95_vm0, %v532_v52 }
 0x45c   :  { %v558_v54 = vld [vmem:[#allocation2 + $0x30] sm:$0xff] }
 0x45d   :  { %v556_v53 = vld [vmem:[#allocation2 + $0x20] sm:$0xff]  ;;  %v573_v63 = vadd.f32 %v1737_v36, %v558_v54 }
 0x45e   :  { %v559_v56 = vld [vmem:[#allocation2 + $0x38] sm:$0xff]  ;;  %v571_v60 = vadd.f32 %v1737_v36, %v556_v53 }
 0x45f   :  { %v557_v57 = vld [vmem:[#allocation2 + $0x28] sm:$0xff]  ;;  %v574_v59 = vadd.f32 %v1737_v36, %v559_v56 }
 0x460   :  { %v572_v61 = vadd.f32 %v1737_v36, %v557_v57 }
 0x461   :  { %v578_v2 = vpack.c.bf16 %v574_v59, %v573_v63 }
 0x462   :  { %v577_v1 = vpack.c.bf16 %v572_v61, %v571_v60 }
 0x464   :  { %1927 = vmatprep.mubr.msk.bf16.mxu0 %vm95_vm0, %v577_v1 }
 0x465   :  { %1928 = vmatmul.mubr.msk.bf16.gmra.mrb[12].mxu0 %vm95_vm0, %v578_v2 }
 0x529   :  { %v1925_v5 = vpop.f32.mrb[8].mxu0 }
 0x52a   :  { %688 = vrot.lane.b32.xlu0 %v1925_v5, %s2178_s27  ;;  %v641_v6 = vpop.f32.mrb[9].mxu0 }
 0x52b   :  { %v1926_v8 = vpop.f32.mrb[10].mxu0 }
 0x52c   :  { %v673_v11 = vpack.c.bf16 %v1926_v8, %v1925_v5  ;;  %v644_v14 = vpop.f32.mrb[11].mxu0 }
 0x52d   :  { %v672_v17 = vpack.c.bf16 %v644_v14, %v641_v6  ;;  %686 = vrot.lane.b32.xlu1 %v644_v14, %s2178_s27 }
 0x52e   :  { %684 = vrot.lane.b32.xlu0 %v641_v6, %s2178_s27 }
 0x52f   :  { %1931 = vmatprep.subr.bf16.mxu1 %v672_v17 }
 0x530   :  { %1932 = vmatpush3.bf16.msra.mxu1 %v672_v17 }
 0x531   :  { %1933 = vmatprep.subr.bf16.mxu1 %v673_v11 }
 0x532   :  { %690 = vrot.lane.b32.xlu0 %v1926_v8, %s2178_s27 }
 0x534   :  { %1934 = vmatpush3.bf16.msra.mxu1 %v673_v11 }
 0x538   :  { %v1929_v18 = vpop.f32.mrb[12].mxu0 }
 0x539   :  { %696 = vrot.lane.b32.xlu1 %v1929_v18, %s2178_s27  ;;  %v657_v20 = vpop.f32.mrb[13].mxu0 }
 0x53a   :  { %692 = vrot.lane.b32.xlu0 %v657_v20, %s2178_s27  ;;  %v1930_v21 = vpop.f32.mrb[14].mxu0 }
 0x53b   :  { %v675_v23 = vpack.c.bf16 %v1930_v21, %v1929_v18  ;;  %v660_v19 = vpop.f32.mrb[15].mxu0 }
 0x53c   :  { %v674_v24 = vpack.c.bf16 %v660_v19, %v657_v20 }
 0x53d   :  { %716 = vrot.lane.b32.xlu1 %v641_v6, %s2179_s26 }
 0x53e   :  { %694 = vrot.lane.b32.xlu0 %v660_v19, %s2178_s27  ;;  %1935 = vmatprep.subr.bf16.mxu1 %v674_v24 }
 0x53f   :  { %1936 = vmatpush3.bf16.msra.mxu1 %v674_v24 }
 0x540   :  { %1937 = vmatprep.subr.bf16.mxu1 %v675_v23 }
 0x541   :  { %720 = vrot.lane.b32.xlu1 %v1925_v5, %s2179_s26 }
 0x542   :  { %698 = vrot.lane.b32.xlu0 %v1930_v21, %s2178_s27 }
 0x543   :  { %1938 = vmatpush3.bf16.msra.mxu1 %v675_v23 }
 0x545   :  { %724 = vrot.lane.b32.xlu1 %v657_v20, %s2179_s26 }
 0x546   :  { %718 = vrot.lane.b32.xlu0 %v644_v14, %s2179_s26 }
 0x549   :  { %728 = vrot.lane.b32.xlu1 %v1929_v18, %s2179_s26 }
 0x54a   :  { %722 = vrot.lane.b32.xlu0 %v1926_v8, %s2179_s26 }
 0x54e   :  { %726 = vrot.lane.b32.xlu0 %v660_v19, %s2179_s26 }
 0x552   :  { %730 = vrot.lane.b32.xlu0 %v1930_v21, %s2179_s26 }
 0x59c   :  { %v689_v15 = vpop.permute.xlu0 %688 }
 0x59d   :  { %710 = vst.msk [vmem:[#allocation3 + $0x10] sm:$0xff] %vm209_vm1, %v689_v15 }
 0x59f   :  { %v687_v12 = vpop.permute.xlu1 %686 }
 0x5a0   :  { %709 = vst.msk [vmem:[#allocation3 + $0x8] sm:$0xff] %vm209_vm1, %v687_v12  ;;  %v685_v25 = vpop.permute.xlu0 %684 }
 0x5a1   :  { %708 = vst.msk [vmem:[#allocation3] sm:$0xff] %vm209_vm1, %v685_v25 }
 0x5a4   :  { %v691_v26 = vpop.permute.xlu0 %690  ;;  %v774_v27 = vld [vmem:[#allocation3 + $0x10] sm:$0xff] }
 0x5a5   :  { %711 = vst.msk [vmem:[#allocation3 + $0x18] sm:$0xff] %vm209_vm1, %v691_v26  ;;  %808 = vperm.xlu1 %2039, %v774_v27  }
 0x5a7   :  { %v773_v29 = vld [vmem:[#allocation3 + $0x8] sm:$0xff] }
 0x5a8   :  { %803 = vperm.xlu0 %2040, %v773_v29   ;;  %v772_v31 = vld [vmem:[#allocation3] sm:$0xff] }
 0x5a9   :  { %798 = vperm.xlu1 %2039, %v772_v31  }
 0x5ab   :  { %v697_v32 = vpop.permute.xlu1 %696 }
 0x5ac   :  { %714 = vst.msk [vmem:[#allocation3 + $0x30] sm:$0xff] %vm209_vm1, %v697_v32  ;;  %v693_v33 = vpop.permute.xlu0 %692  ;;  %v775_v34 = vld [vmem:[#allocation3 + $0x18] sm:$0xff] }
 0x5ad   :  { %712 = vst.msk [vmem:[#allocation3 + $0x20] sm:$0xff] %vm209_vm1, %v693_v33  ;;  %813 = vperm.xlu0 %2040, %v775_v34  }
 0x5af   :  { %v717_v43 = vpop.permute.xlu1 %716 }
 0x5b0   :  { %v695_v36 = vpop.permute.xlu0 %694 }
 0x5b1   :  { %713 = vst.msk [vmem:[#allocation3 + $0x28] sm:$0xff] %vm209_vm1, %v695_v36 }
 0x5b3   :  { %v778_v37 = vld [vmem:[#allocation3 + $0x30] sm:$0xff]  ;;  %v721_v46 = vpop.permute.xlu1 %720 }
 0x5b4   :  { %828 = vperm.xlu1 %2039, %v778_v37   ;;  %v699_v39 = vpop.permute.xlu0 %698  ;;  %v776_v40 = vld [vmem:[#allocation3 + $0x20] sm:$0xff] }
 0x5b5   :  { %715 = vst.msk [vmem:[#allocation3 + $0x38] sm:$0xff] %vm209_vm1, %v699_v39 }
 0x5b7   :  { %v725_v48 = vpop.permute.xlu1 %724 }
 0x5b8   :  { %818 = vperm.xlu1 %2039, %v776_v40   ;;  %v777_v41 = vld [vmem:[#allocation3 + $0x28] sm:$0xff]  ;;  %v719_v45 = vpop.permute.xlu0 %718 }
 0x5b9   :  { %823 = vperm.xlu0 %2040, %v777_v41  }
 0x5bb   :  { %v729_v50 = vpop.permute.xlu1 %728 }
 0x5bc   :  { %v779_v42 = vld [vmem:[#allocation3 + $0x38] sm:$0xff]  ;;  %v723_v47 = vpop.permute.xlu0 %722 }
 0x5bd   :  { %833 = vperm.xlu0 %2040, %v779_v42  }
 0x5c0   :  { %v727_v49 = vpop.permute.xlu0 %726 }
 0x5c4   :  { %v731_v52 = vpop.permute.xlu0 %730 }
 0x5e1   :  { %740 = vxpose.xlu1.b32.start [1/8] (short) (narrow) %v717_v43, 8 }
 0x5e5   :  { %741 = vxpose.xlu1.b32.cont [2/8] (short) (narrow) %v719_v45, 8 }
 0x5e9   :  { %742 = vxpose.xlu1.b32.cont [3/8] (short) (narrow) %v721_v46, 8 }
 0x5ed   :  { %743 = vxpose.xlu1.b32.cont [4/8] (short) (narrow) %v723_v47, 8 }
 0x5f1   :  { %744 = vxpose.xlu1.b32.cont [5/8] (short) (narrow) %v725_v48, 8 }
 0x5f5   :  { %745 = vxpose.xlu1.b32.cont [6/8] (short) (narrow) %v727_v49, 8 }
 0x5f9   :  { %746 = vxpose.xlu1.b32.cont [7/8] (short) (narrow) %v729_v50, 8 }
 0x5fd   :  { %747 = vxpose.xlu1.b32.end [8/8] (short) (narrow) %v731_v52, 8 }
 0x624   :  { %v809_v53 = vpop.permute.xlu1 %808 }
 0x627   :  { %v804_v57 = vpop.permute.xlu0 %803 }
 0x628   :  { %v799_v54 = vpop.permute.xlu1 %798 }
 0x62c   :  { %v814_v63 = vpop.permute.xlu0 %813 }
 0x633   :  { %v829_v56 = vpop.permute.xlu1 %828 }
 0x637   :  { %v819_v59 = vpop.permute.xlu1 %818 }
 0x638   :  { %v824_v15 = vpop.permute.xlu0 %823 }
 0x63c   :  { %v834_v33 = vpop.permute.xlu0 %833 }
 0x661   :  { %v756_v60 = vpop.trf.xlu1 }
 0x662   :  { %v839_v61 = vrot.slane %v756_v60, %v340_v58 }
 0x664   :  { %v842_v1 = vadd.f32 %v839_v61, %v809_v53  ;;  %v840_v2 = vadd.f32 %v839_v61, %v799_v54  ;;  %v843_v5 = vadd.f32 %v839_v61, %v814_v63  ;;  %v841_v18 = vadd.f32 %v839_v61, %v804_v57 }
 0x665   :  { %v846_v21 = vadd.f32 %v839_v61, %v829_v56  ;;  %v844_v24 = vadd.f32 %v839_v61, %v819_v59  ;;  %v847_v34 = vadd.f32 %v839_v61, %v834_v33 }
 0x666   :  { %v850_v6 = vmul.f32 0.2, %v842_v1  ;;  %v848_v8 = vmul.f32 0.2, %v840_v2  ;;  %v851_v17 = vmul.f32 0.2, %v843_v5 }
 0x667   :  { %v849_v19 = vmul.f32 0.2, %v841_v18  ;;  %v854_v27 = vmul.f32 0.2, %v846_v21  ;;  %v852_v32 = vmul.f32 0.2, %v844_v24 }
 0x668   :  { %v858_v11 = vmax.f32 %v842_v1, %v850_v6  ;;  %v856_v14 = vmax.f32 %v840_v2, %v848_v8  ;;  %v859_v58 = vmax.f32 %v843_v5, %v851_v17 }
 0x669   :  { %v857_v26 = vmax.f32 %v841_v18, %v849_v19 }
 0x66a   :  { %v866_v20 = vadd.f32 %v1797_v3, %v858_v11  ;;  %v864_v55 = vadd.f32 %v1793_v7, %v856_v14  ;;  %v867_v25 = vadd.f32 %v1798_v16, %v859_v58  ;;  %v845_v3 = vadd.f32 %v839_v61, %v824_v15 }
 0x66b   :  { %v865_v31 = vadd.f32 %v1794_v22, %v857_v26  ;;  %v862_v7 = vmax.f32 %v846_v21, %v854_v27  ;;  %v860_v16 = vmax.f32 %v844_v24, %v852_v32  ;;  %v855_v22 = vmul.f32 0.2, %v847_v34 }
 0x66c   :  { %v878_v23 = vsel %vm374_vm2, %v866_v20, -inf  ;;  %v872_v12 = vsel %vm374_vm2, %v864_v55, -inf  ;;  %v881_v29 = vsel %vm374_vm2, %v867_v25, -inf  ;;  %v853_v37 = vmul.f32 0.2, %v845_v3 }
 0x66d   :  { %879 = vmax.xlane.f32.xlu0 %v878_v23  ;;  %v875_v36 = vsel %vm374_vm2, %v865_v31, -inf  ;;  %v870_v62 = vadd.f32 %v1805_v30, %v862_v7  ;;  %v868_v40 = vadd.f32 %v1801_v38, %v860_v16  ;;  %v863_v43 = vmax.f32 %v847_v34, %v855_v22 }
 0x66e   :  { %v861_v0 = vmax.f32 %v845_v3, %v853_v37 }
 0x66f   :  { %v890_v39 = vsel %vm374_vm2, %v870_v62, -inf  ;;  %v884_v41 = vsel %vm374_vm2, %v868_v40, -inf  ;;  %v871_v45 = vadd.f32 %v1806_v51, %v863_v43 }
 0x670   :  { %v869_v42 = vadd.f32 %v1802_v44, %v861_v0 }
 0x671   :  { %873 = vmax.xlane.f32.xlu0 %v872_v12  ;;  %v893_v46 = vsel %vm374_vm2, %v871_v45, -inf }
 0x672   :  { %v887_v30 = vsel %vm374_vm2, %v869_v42, -inf }
 0x675   :  { %882 = vmax.xlane.f32.xlu0 %v881_v29 }
 0x679   :  { %876 = vmax.xlane.f32.xlu0 %v875_v36 }
 0x67d   :  { %891 = vmax.xlane.f32.xlu0 %v890_v39 }
 0x681   :  { %885 = vmax.xlane.f32.xlu0 %v884_v41 }
 0x685   :  { %888 = vmax.xlane.f32.xlu0 %v887_v30 }
 0x689   :  { %894 = vmax.xlane.f32.xlu0 %v893_v46 }
 0x6fa   :  { %v880_v38 = vpop.xlane.xlu0 %879 }
 0x6fb   :  { %v898_v47 = vsub.f32 %v866_v20, %v880_v38 }
 0x6fd   :  { %v908_v48 = vmul.f32 1.442695, %v898_v47 }
 0x6fe   :  { %v874_v49 = vpop.xlane.xlu0 %873 }
 0x6ff   :  { %2089 = vpow2.f32 %v908_v48  ;;  %v896_v50 = vsub.f32 %v864_v55, %v874_v49 }
 0x701   :  { %v904_v52 = vmul.f32 1.442695, %v896_v50 }
 0x702   :  { %v883_v35 = vpop.xlane.xlu0 %882 }
 0x703   :  { %2091 = vpow2.f32 %v904_v52  ;;  %v899_v44 = vsub.f32 %v867_v25, %v883_v35 }
 0x705   :  { %v910_v53 = vmul.f32 1.442695, %v899_v44 }
 0x706   :  { %v877_v54 = vpop.xlane.xlu0 %876 }
 0x707   :  { %2093 = vpow2.f32 %v910_v53  ;;  %v897_v56 = vsub.f32 %v865_v31, %v877_v54  ;;  %v2045_v53 = vld [vmem:[%s2664_s9] sm:$0xff]  }
 0x708   :  { %v2046_v54 = vld [vmem:[%s2666_s11] sm:$0xff]   ;;  %1947 = vmatprep.subr.bf16.mxu0 %v2045_v53 }
 0x709   :  { %v2090_v28 = vpop.eup %2089  ;;  %v906_v51 = vmul.f32 1.442695, %v897_v56  ;;  %v2047_v56 = vld [vmem:[%s2664_s9 + $0x8] sm:$0xff]   ;;  %1971 = vmatprep.subr.bf16.mxu1 %v2046_v54  ;;  %1948 = vmatpush3.bf16.msra.mxu0 %v2045_v53 }
 0x70a   :  { %v892_v57 = vpop.xlane.xlu0 %891  ;;  %v926_v59 = vsel %vm374_vm2, %v2090_v28, 0.0  ;;  %1949 = vmatprep.subr.bf16.mxu0 %v2047_v56 }
 0x70b   :  { %2095 = vpow2.f32 %v906_v51  ;;  %v902_v60 = vsub.f32 %v870_v62, %v892_v57  ;;  %927 = vadd.xlane.f32.xlu1 %v926_v59  ;;  %v2049_v51 = vld [vmem:[%s2663_s8] sm:$0xff]  }
 0x70d   :  { %v2092_v61 = vpop.eup %2091  ;;  %v916_v63 = vmul.f32 1.442695, %v902_v60  ;;  %1950 = vmatpush3.bf16.msra.mxu0 %v2047_v56 }
 0x70e   :  { %v886_v1 = vpop.xlane.xlu0 %885  ;;  %v920_v2 = vsel %vm374_vm2, %v2092_v61, 0.0  ;;  %1959 = vmatprep.subr.bf16.mxu0 %v2049_v51 }
 0x70f   :  { %2097 = vpow2.f32 %v916_v63  ;;  %v900_v5 = vsub.f32 %v868_v40, %v886_v1  ;;  %921 = vadd.xlane.f32.xlu0 %v920_v2  ;;  %v1748_v1 = vld [vmem:[%s2688_s24] ss:$0 sm:$0xff] }
 0x711   :  { %v2094_v6 = vpop.eup %2093  ;;  %v912_v8 = vmul.f32 1.442695, %v900_v5 }
 0x712   :  { %v889_v11 = vpop.xlane.xlu0 %888  ;;  %v929_v14 = vsel %vm374_vm2, %v2094_v6, 0.0 }
 0x713   :  { %2099 = vpow2.f32 %v912_v8  ;;  %v901_v17 = vsub.f32 %v869_v42, %v889_v11  ;;  %930 = vadd.xlane.f32.xlu0 %v929_v14 }
 0x715   :  { %v2096_v18 = vpop.eup %2095  ;;  %v914_v20 = vmul.f32 1.442695, %v901_v17 }
 0x716   :  { %v895_v21 = vpop.xlane.xlu0 %894  ;;  %v923_v23 = vsel %vm374_vm2, %v2096_v18, 0.0 }
 0x717   :  { %2101 = vpow2.f32 %v914_v20  ;;  %v903_v55 = vsub.f32 %v871_v45, %v895_v21  ;;  %924 = vadd.xlane.f32.xlu0 %v923_v23  ;;  %v2050_v23 = vld [vmem:[%s2663_s8 + $0x8] sm:$0xff]  }
 0x719   :  { %v2098_v58 = vpop.eup %2097  ;;  %v918_v19 = vmul.f32 1.442695, %v903_v55 }
 0x71a   :  { %v938_v24 = vsel %vm374_vm2, %v2098_v58, 0.0 }
 0x71b   :  { %2103 = vpow2.f32 %v918_v19  ;;  %939 = vadd.xlane.f32.xlu0 %v938_v24 }
 0x71d   :  { %v2100_v15 = vpop.eup %2099 }
 0x71e   :  { %v932_v12 = vsel %vm374_vm2, %v2100_v15, 0.0 }
 0x71f   :  { %933 = vadd.xlane.f32.xlu0 %v932_v12 }
 0x721   :  { %v2102_v25 = vpop.eup %2101 }
 0x722   :  { %v935_v26 = vsel %vm374_vm2, %v2102_v25, 0.0 }
 0x723   :  { %936 = vadd.xlane.f32.xlu0 %v935_v26 }
 0x725   :  { %v2104_v27 = vpop.eup %2103 }
 0x726   :  { %v941_v3 = vsel %vm374_vm2, %v2104_v27, 0.0 }
 0x727   :  { %942 = vadd.xlane.f32.xlu0 %v941_v3 }
 0x798   :  { %v928_v7 = vpop.xlane.xlu1 %927 }
 0x79c   :  { %v922_v29 = vpop.xlane.xlu0 %921 }
 0x7a0   :  { %v931_v31 = vpop.xlane.xlu0 %930 }
 0x7a1   :  { %2105 = vrcp.f32 %v931_v31 }
 0x7a2   :  { %2107 = vrcp.f32 %v922_v29 }
 0x7a3   :  { %2109 = vrcp.f32 %v928_v7 }
 0x7a4   :  { %v925_v32 = vpop.xlane.xlu0 %924 }
 0x7a5   :  { %2111 = vrcp.f32 %v925_v32  ;;  %v2180_v32 = vmov 0.0  }
 0x7a8   :  { %v940_v33 = vpop.xlane.xlu0 %939 }
 0x7ab   :  { %v2106_v34 = vpop.eup %2105 }
 0x7ac   :  { %v934_v36 = vpop.xlane.xlu0 %933  ;;  %v2108_v62 = vpop.eup %2107  ;;  %v955_v39 = vmul.f32 %v2106_v34, %v2094_v6 }
 0x7ad   :  { %v2110_v16 = vpop.eup %2109  ;;  %2113 = vrcp.f32 %v934_v36  ;;  %v952_v0 = vmul.f32 %v2108_v62, %v2092_v61 }
 0x7ae   :  { %v954_v41 = vmul.f32 %v2110_v16, %v2090_v28  ;;  %v2048_v28 = vld [vmem:[%s2666_s11 + $0x8] sm:$0xff]  }
 0x7af   :  { %v2112_v37 = vpop.eup %2111 }
 0x7b0   :  { %v937_v40 = vpop.xlane.xlu0 %936  ;;  %v953_v22 = vmul.f32 %v2112_v37, %v2096_v18  ;;  %v961_v43 = vpack.c.bf16 %v955_v39, %v954_v41  ;;  %v1761_v39 = vld [vmem:[%s2665_s10] ss:$0 sm:$0xff] }
 0x7b1   :  { %2115 = vrcp.f32 %v937_v40 }
 0x7b2   :  { %v960_v42 = vpack.c.bf16 %v953_v22, %v952_v0  ;;  %2117 = vrcp.f32 %v940_v33 }
 0x7b4   :  { %1939 = vmatprep.mubr.msk.bf16.mxu1 %vm374_vm2, %v960_v42  ;;  %v943_v30 = vpop.xlane.xlu0 %942 }
 0x7b5   :  { %2119 = vrcp.f32 %v943_v30  ;;  %1940 = vmatmul.mubr.msk.bf16.vlgmr.msra.gmra.mrb[8].mxu1 %vm374_vm2, %v961_v43 }
 0x7b6   :  { %1972 = vmatpush3.bf16.msra.mxu1 %v2046_v54 }
 0x7b7   :  { %v2114_v45 = vpop.eup %2113  ;;  %1973 = vmatprep.subr.bf16.mxu1 %v2048_v28 }
 0x7b8   :  { %v956_v38 = vmul.f32 %v2114_v45, %v2100_v15 }
 0x7ba   :  { %1974 = vmatpush3.bf16.msra.mxu1 %v2048_v28 }
 0x7bb   :  { %v2116_v46 = vpop.eup %2115  ;;  %1983 = vmatprep.subr.bf16.mxu1 %v2180_v32 }
 0x7bc   :  { %v957_v47 = vmul.f32 %v2116_v46, %v2102_v25  ;;  %v2118_v48 = vpop.eup %2117 }
 0x7bd   :  { %v958_v52 = vmul.f32 %v2118_v48, %v2098_v58 }
 0x7be   :  { %v962_v49 = vpack.c.bf16 %v957_v47, %v956_v38 }
 0x7bf   :  { %v2120_v50 = vpop.eup %2119 }
 0x7c0   :  { %1943 = vmatprep.mubr.msk.bf16.mxu1 %vm374_vm2, %v962_v49  ;;  %v959_v35 = vmul.f32 %v2120_v50, %v2104_v27 }
 0x7c2   :  { %v963_v44 = vpack.c.bf16 %v959_v35, %v958_v52 }
 0x7c4   :  { %1944 = vmatmul.mubr.msk.bf16.gmra.mrb[12].mxu1 %vm374_vm2, %v963_v44 }
 0x888   :  { %v1941_v57 = vpop.f32.mrb[8].mxu1 }
 0x889   :  { %1043 = vst.msk [vmem:[#allocation2 + $0x10] sm:$0xff] %vm95_vm0, %v1941_v57  ;;  %v1010_v59 = vpop.f32.mrb[9].mxu1 }
 0x88a   :  { %1041 = vst.msk [vmem:[#allocation2] sm:$0xff] %vm95_vm0, %v1010_v59  ;;  %v1942_v60 = vpop.f32.mrb[10].mxu1 }
 0x88b   :  { %1044 = vst.msk [vmem:[#allocation2 + $0x18] sm:$0xff] %vm95_vm0, %v1942_v60  ;;  %v1013_v61 = vpop.f32.mrb[11].mxu1 }
 0x88c   :  { %1042 = vst.msk [vmem:[#allocation2 + $0x8] sm:$0xff] %vm95_vm0, %v1013_v61 }
 0x890   :  { %v1051_v2 = vld [vmem:[#allocation2 + $0x10] sm:$0xff] }
 0x891   :  { %v1049_v63 = vld [vmem:[#allocation2] sm:$0xff]  ;;  %v1066_v17 = vadd.f32 %v1748_v1, %v1051_v2 }
 0x892   :  { %v1052_v5 = vld [vmem:[#allocation2 + $0x18] sm:$0xff]  ;;  %v1064_v11 = vadd.f32 %v1748_v1, %v1049_v63 }
 0x893   :  { %v1050_v6 = vld [vmem:[#allocation2 + $0x8] sm:$0xff]  ;;  %v1067_v8 = vadd.f32 %v1748_v1, %v1052_v5 }
 0x894   :  { %v1065_v14 = vadd.f32 %v1748_v1, %v1050_v6 }
 0x895   :  { %v1073_v21 = vpack.c.bf16 %v1067_v8, %v1066_v17  ;;  %v1770_v17 = vld [vmem:[%s2667_s12] ss:$0 sm:$0xff] }
 0x896   :  { %v1072_v18 = vpack.c.bf16 %v1065_v14, %v1064_v11 }
 0x897   :  { %v1945_v20 = vpop.f32.mrb[12].mxu1 }
 0x898   :  { %1047 = vst.msk [vmem:[#allocation2 + $0x30] sm:$0xff] %vm95_vm0, %v1945_v20  ;;  %v1026_v55 = vpop.f32.mrb[13].mxu1  ;;  %1951 = vmatprep.mubr.msk.bf16.mxu0 %vm95_vm0, %v1072_v18  ;;  %1975 = vmatprep.mubr.msk.bf16.mxu1 %vm95_vm0, %v1072_v18 }
 0x899   :  { %1045 = vst.msk [vmem:[#allocation2 + $0x20] sm:$0xff] %vm95_vm0, %v1026_v55  ;;  %v1946_v58 = vpop.f32.mrb[14].mxu1  ;;  %1952 = vmatmul.mubr.msk.bf16.vlgmr.msra.gmra.mrb[16].mxu0 %vm95_vm0, %v1073_v21  ;;  %1976 = vmatmul.mubr.msk.bf16.vlgmr.msra.gmra.mrb[16].mxu1 %vm95_vm0, %v1073_v21 }
 0x89a   :  { %1048 = vst.msk [vmem:[#allocation2 + $0x38] sm:$0xff] %vm95_vm0, %v1946_v58  ;;  %v1029_v19 = vpop.f32.mrb[15].mxu1  ;;  %1960 = vmatpush3.bf16.msra.mxu0 %v2049_v51 }
 0x89b   :  { %1046 = vst.msk [vmem:[#allocation2 + $0x28] sm:$0xff] %vm95_vm0, %v1029_v19  ;;  %1961 = vmatprep.subr.bf16.mxu0 %v2050_v23 }
 0x89e   :  { %1962 = vmatpush3.bf16.msra.mxu0 %v2050_v23 }
 0x89f   :  { %v1055_v15 = vld [vmem:[#allocation2 + $0x30] sm:$0xff]  ;;  %1995 = vmatprep.subr.bf16.mxu0 %v2180_v32 }
 0x8a0   :  { %v1053_v24 = vld [vmem:[#allocation2 + $0x20] sm:$0xff]  ;;  %v1070_v29 = vadd.f32 %v1748_v1, %v1055_v15 }
 0x8a1   :  { %v1056_v12 = vld [vmem:[#allocation2 + $0x38] sm:$0xff]  ;;  %v1068_v27 = vadd.f32 %v1748_v1, %v1053_v24 }
 0x8a2   :  { %v1054_v25 = vld [vmem:[#allocation2 + $0x28] sm:$0xff]  ;;  %v1071_v26 = vadd.f32 %v1748_v1, %v1056_v12 }
 0x8a3   :  { %v1069_v3 = vadd.f32 %v1748_v1, %v1054_v25 }
 0x8a4   :  { %v1075_v7 = vpack.c.bf16 %v1071_v26, %v1070_v29 }
 0x8a5   :  { %v1074_v31 = vpack.c.bf16 %v1069_v3, %v1068_v27 }
 0x8a7   :  { %1955 = vmatprep.mubr.msk.bf16.mxu0 %vm95_vm0, %v1074_v31  ;;  %1979 = vmatprep.mubr.msk.bf16.mxu1 %vm95_vm0, %v1074_v31 }
 0x8a8   :  { %1956 = vmatmul.mubr.msk.bf16.gmra.mrb[20].mxu0 %vm95_vm0, %v1075_v7  ;;  %1980 = vmatmul.mubr.msk.bf16.gmra.mrb[20].mxu1 %vm95_vm0, %v1075_v7 }
 0x8a9   :  { %1963 = vmatprep.mubr.msk.bf16.mxu0 %vm95_vm0, %v2300_v4  ;;  %1991 = vmatprep.mubr.msk.bf16.mxu1 %vm2181_vm3, %v2180_v32  ;;  %v1463_v4 = vld [vmem:[%s2669_s14] sm:$0x1] }
 0x8b0   :  { %1964 = vmatmul.mubr.msk.bf16.vlgmr.msra.gmra.mrb[16].mxu0 %vm95_vm0, %v2316_v9  ;;  %v1470_v9 = vsel %vm1468_vm4, %v1463_v4, 0 }
 0x8b1   :  { %1967 = vmatprep.mubr.msk.bf16.mxu0 %vm95_vm0, %v2318_v10  ;;  %1996 = vmatpush3.bf16.msra.mxu0 %v1470_v9 }
 0x8b2   :  { %2009 = vmatprep.subr.bf16.mxu0 %v2180_v32 }
 0x8b8   :  { %1968 = vmatmul.mubr.msk.bf16.gmra.mrb[20].mxu0 %vm95_vm0, %v2330_v13 }
 0x8b9   :  { %1997 = vmatprep.mubr.msk.bf16.mxu0 %vm2181_vm3, %v2180_v32 }
 0x96c   :  { %v1977_v10 = vpop.f32.mrb[16].mxu1 }
 0x96d   :  { %v2565_v13 = vpop.f32.mrb[17].mxu1  ;;  %v1379_v58 = vadd.f32 %v1977_v10, %v1770_v17 }
 0x96e   :  { %v2567_v33 = vpop.f32.mrb[18].mxu1  ;;  %v1371_v15 = vadd.f32 %v1770_v17, %v2565_v13 }
 0x96f   :  { %v2569_v34 = vpop.f32.mrb[19].mxu1  ;;  %v1382_v25 = vadd.f32 %v2567_v33, %v1770_v17 }
 0x970   :  { %v1374_v3 = vadd.f32 %v1770_v17, %v2569_v34 }
 0x97b   :  { %v2571_v36 = vpop.f32.mrb[20].mxu1 }
 0x97c   :  { %v2573_v62 = vpop.f32.mrb[21].mxu1 }
 0x97d   :  { %v2575_v16 = vpop.f32.mrb[22].mxu1  ;;  %v1387_v13 = vadd.f32 %v1770_v17, %v2573_v62  ;;  %v1413_v62 = vld [vmem:[%s2661_s6] sm:$0x1] }
 0x97e   :  { %v2577_v37 = vpop.f32.mrb[23].mxu1  ;;  %v1398_v33 = vadd.f32 %v2575_v16, %v1770_v17  ;;  %v2051_v16 = vld [vmem:[%s2668_s13] sm:$0xff]  }
 0x97f   :  { %v1390_v34 = vadd.f32 %v1770_v17, %v2577_v37  ;;  %v2052_v37 = vld [vmem:[%s2668_s13 + $0x8] sm:$0xff]  }
 0x983   :  { %v1965_v40 = vpop.f32.mrb[16].mxu0 }
 0x984   :  { %v1259_v0 = vadd.f32 %v1965_v40, %v1761_v39  ;;  %v1219_v22 = vpop.f32.mrb[17].mxu0 }
 0x985   :  { %v1257_v41 = vadd.f32 %v1761_v39, %v1219_v22  ;;  %v1966_v42 = vpop.f32.mrb[18].mxu0 }
 0x986   :  { %v1764_v43 = vmul.f32 -1.442695, %v1259_v0  ;;  %v1260_v30 = vadd.f32 %v1966_v42, %v1761_v39  ;;  %v1222_v45 = vpop.f32.mrb[19].mxu0 }
 0x987   :  { %v1762_v46 = vmul.f32 -1.442695, %v1257_v41  ;;  %v1258_v38 = vadd.f32 %v1761_v39, %v1222_v45 }
 0x988   :  { %2121 = vpow2.f32 %v1764_v43  ;;  %v1765_v47 = vmul.f32 -1.442695, %v1260_v30 }
 0x989   :  { %2123 = vpow2.f32 %v1762_v46  ;;  %v1763_v48 = vmul.f32 -1.442695, %v1258_v38  ;;  %v1462_v38 = vld [vmem:[%s2662_s7] sm:$0x1] }
 0x98a   :  { %2125 = vpow2.f32 %v1765_v47  ;;  %1998 = vmatmul.mubr.msk.bf16.vlgmr.msra.gmra.mrb[24].mxu0 %vm1464_vm5, %v1462_v38 }
 0x98b   :  { %2127 = vpow2.f32 %v1763_v48  ;;  %v1969_v49 = vpop.f32.mrb[20].mxu0  ;;  %2013 = vmatprep.mubr.msk.bf16.mxu0 %vm2181_vm3, %v2180_v32 }
 0x98c   :  { %v1263_v50 = vadd.f32 %v1969_v49, %v1761_v39  ;;  %v1235_v52 = vpop.f32.mrb[21].mxu0 }
 0x98d   :  { %v1261_v35 = vadd.f32 %v1761_v39, %v1235_v52  ;;  %v1970_v44 = vpop.f32.mrb[22].mxu0 }
 0x98e   :  { %v1768_v53 = vmul.f32 -1.442695, %v1263_v50  ;;  %v1264_v54 = vadd.f32 %v1970_v44, %v1761_v39  ;;  %v1238_v56 = vpop.f32.mrb[23].mxu0 }
 0x98f   :  { %v1766_v28 = vmul.f32 -1.442695, %v1261_v35  ;;  %v1262_v51 = vadd.f32 %v1761_v39, %v1238_v56  ;;  %v1395_v39 = vadd.f32 %v2571_v36, %v1770_v17  ;;  %v2053_v56 = vld [vmem:[%s2671_s16] sm:$0xff]  }
 0x990   :  { %2129 = vpow2.f32 %v1768_v53  ;;  %v1769_v57 = vmul.f32 -1.442695, %v1264_v54  ;;  %2010 = vmatpush3.bf16.msra.mxu0 %v2053_v56 }
 0x991   :  { %2131 = vpow2.f32 %v1766_v28  ;;  %v1767_v59 = vmul.f32 -1.442695, %v1262_v51  ;;  %2011 = vmatprep.subr.bf16.mxu0 %v2180_v32  ;;  %v2054_v28 = vld [vmem:[%s2671_s16 + $0x8] sm:$0xff]  }
 0x992   :  { %v2122_v60 = vpop.eup %2121  ;;  %2133 = vpow2.f32 %v1769_v57  ;;  %v1782_v57 = vld [vmem:[%s2670_s15] ss:$0 sm:$0xff] }
 0x993   :  { %v2124_v61 = vpop.eup %2123  ;;  %v1291_v63 = vadd.f32 1.0, %v2122_v60  ;;  %2135 = vpow2.f32 %v1767_v59 }
 0x994   :  { %v2126_v1 = vpop.eup %2125  ;;  %v1289_v2 = vadd.f32 1.0, %v2124_v61  ;;  %2012 = vmatpush3.bf16.msra.mxu0 %v2054_v28 }
 0x995   :  { %v2128_v5 = vpop.eup %2127  ;;  %2137 = vrcp.f32 %v1291_v63  ;;  %v1292_v6 = vadd.f32 1.0, %v2126_v1 }
 0x996   :  { %2139 = vrcp.f32 %v1289_v2  ;;  %v1290_v8 = vadd.f32 1.0, %v2128_v5 }
 0x997   :  { %2141 = vrcp.f32 %v1292_v6  ;;  %v2055_v6 = vld [vmem:[%s2673_s18] sm:$0xff]  }
 0x998   :  { %2143 = vrcp.f32 %v1290_v8  ;;  %v2056_v8 = vld [vmem:[%s2673_s18 + $0x8] sm:$0xff]   ;;  %s1719_s18 = sshll.u32 %s2182_s3, 4  ;;  %s1720_s18 = int_to_ptr.vmem [resolvable:$true] %s1719_s18 }
 0x999   :  { %p2158_p1 = scmp.lt.s32.totalorder %s1720_s18, %s1720_s18 }
 0x99a   :  { %v2130_v11 = vpop.eup %2129 }
 0x99b   :  { %v2132_v14 = vpop.eup %2131  ;;  %v1295_v18 = vadd.f32 1.0, %v2130_v11  ;;  %v1783_v11 = vld [vmem:[%s2672_s17] ss:$0 sm:$0xff]  ;;  %s2153_s17 = scalar_lea.vmem %s1720_s18, 32 }
 0x99c   :  { %v2134_v20 = vpop.eup %2133  ;;  %v1293_v21 = vadd.f32 1.0, %v2132_v14  ;;  %p2154_p0 = scmp.ne.s32.totalorder %s1720_s18, %s2153_s17  ;;  %p2159_p2 = scmp.lt.s32.totalorder %s2153_s17, %s2153_s17 }
 0x99d   :  { %v2136_v23 = vpop.eup %2135  ;;  %2145 = vrcp.f32 %v1295_v18  ;;  %v1296_v55 = vadd.f32 1.0, %v2134_v20 }
 0x99e   :  { %2147 = vrcp.f32 %v1293_v21  ;;  %v1294_v19 = vadd.f32 1.0, %v2136_v23  ;;  %p2160_p3 = por %p2159_p2, %p2158_p1 }
 0x99f   :  { %v2138_v24 = vpop.eup %2137  ;;  %2149 = vrcp.f32 %v1296_v55 }
 0x9a0   :  { %v2140_v12 = vpop.eup %2139  ;;  %2151 = vrcp.f32 %v1294_v19  ;;  %v1403_v26 = vmul.f32 %v2138_v24, %v1379_v58  ;;  %p2161_p4 = pnand %p2160_p3, %p2154_p0 }
 0x9a1   :  { %v2142_v27 = vpop.eup %2141  ;;  %v1401_v29 = vmul.f32 %v2140_v12, %v1371_v15 }
 0x9a2   :  { %v2144_v31 = vpop.eup %2143  ;;  %v1404_v7 = vmul.f32 %v2142_v27, %v1382_v25 }
 0x9a3   :  { %v1402_v4 = vmul.f32 %v2144_v31, %v1374_v3 }
 0x9a4   :  { %v1410_v9 = vpack.c.bf16 %v1404_v7, %v1403_v26 }
 0x9a5   :  { %v1409_v10 = vpack.c.bf16 %v1402_v4, %v1401_v29 }
 0x9a7   :  { %v2146_v40 = vpop.eup %2145  ;;  %1984 = vmatpush3.bf16.msra.mxu1 %v1409_v10 }
 0x9a8   :  { %v2148_v0 = vpop.eup %2147  ;;  %1985 = vmatprep.subr.bf16.mxu1 %v2180_v32  ;;  %v1407_v22 = vmul.f32 %v2146_v40, %v1395_v39 }
 0x9a9   :  { %v2150_v41 = vpop.eup %2149  ;;  %v1405_v42 = vmul.f32 %v2148_v0, %v1387_v13 }
 0x9aa   :  { %v2152_v43 = vpop.eup %2151  ;;  %v1408_v30 = vmul.f32 %v2150_v41, %v1398_v33 }
 0x9ab   :  { %1986 = vmatpush3.bf16.msra.mxu1 %v1410_v9  ;;  %v1406_v45 = vmul.f32 %v2152_v43, %v1390_v34 }
 0x9ac   :  { %1987 = vmatprep.subr.bf16.mxu1 %v2180_v32  ;;  %v1412_v36 = vpack.c.bf16 %v1408_v30, %v1407_v22 }
 0x9ad   :  { %v1411_v46 = vpack.c.bf16 %v1406_v45, %v1405_v42 }
 0x9af   :  { %1988 = vmatpush3.bf16.msra.mxu1 %v1411_v46 }
 0x9b0   :  { %1989 = vmatprep.subr.bf16.mxu1 %v2180_v32 }
 0x9b3   :  { %1990 = vmatpush3.bf16.msra.mxu1 %v1412_v36 }
 0x9b4   :  { %2001 = vmatprep.subr.bf16.mxu1 %v2180_v32 }
 0x9b6   :  { %1992 = vmatmul.mubr.msk.bf16.vlgmr.msra.gmra.mrb[24].mxu1 %vm374_vm2, %v1413_v62 }
 0x9b7   :  { %2002 = vmatpush3.bf16.msra.mxu1 %v2051_v16  ;;  %2005 = vmatprep.mubr.msk.bf16.mxu1 %vm2181_vm3, %v2180_v32 }
 0x9b8   :  { %2003 = vmatprep.subr.bf16.mxu1 %v2180_v32 }
 0x9bb   :  { %2004 = vmatpush3.bf16.msra.mxu1 %v2052_v37 }
 0x9bc   :  { %2017 = vmatprep.subr.bf16.mxu1 %v2180_v32 }
 0xa5d   :  { %v1506_v35 = vpop.f32.mrb[24].mxu0 }
 0xa5e   :  { %v1999_v44 = vpop.f32.mrb[25].mxu0 }
 0xa5f   :  { %v1509_v53 = vpop.f32.mrb[26].mxu0 }
 0xa60   :  { %v2000_v54 = vpop.f32.mrb[27].mxu0 }
 0xa89   :  { %v1451_v47 = vpop.f32.mrb[24].mxu1 }
 0xa8a   :  { %v1457_v48 = vpack.c.bf16 %v1451_v47, %v1451_v47  ;;  %v1993_v49 = vpop.f32.mrb[25].mxu1 }
 0xa8b   :  { %v1454_v50 = vpop.f32.mrb[26].mxu1 }
 0xa8c   :  { %v1994_v52 = vpop.f32.mrb[27].mxu1  ;;  %2006 = vmatmul.mubr.msk.bf16.vlgmr.msra.gmra.mrb[28].mxu1 %vm95_vm0, %v1457_v48 }
 0xa8d   :  { %2021 = vmatprep.mubr.msk.bf16.mxu1 %vm2181_vm3, %v2180_v32  ;;  %2018 = vmatpush3.bf16.msra.mxu1 %v2055_v6 }
 0xa8e   :  { %2019 = vmatprep.subr.bf16.mxu1 %v2180_v32  ;;  %v1787_v32 = vld [vmem:[%s2674_s19] ss:$0 sm:$0xff] }
 0xa91   :  { %2020 = vmatpush3.bf16.msra.mxu1 %v2056_v8 }
 0xb5f   :  { %v1561_v51 = vpop.f32.mrb[28].mxu1 }
 0xb60   :  { %v1562_v59 = vadd.f32 %v1561_v51, %v1506_v35  ;;  %v2007_v60 = vpop.f32.mrb[29].mxu1 }
 0xb61   :  { %v1564_v61 = vpop.f32.mrb[30].mxu1 }
 0xb62   :  { %v1574_v63 = vadd.f32 %v1782_v57, %v1562_v59  ;;  %v2008_v1 = vpop.f32.mrb[31].mxu1 }
 0xb64   :  { %v1575_v2 = vmax.f32 %v1574_v63, 0.0 }
 0xb66   :  { %v1576_v5 = vpack.c.bf16 %v1575_v2, %v1575_v2 }
 0xb68   :  { %2014 = vmatmul.mubr.msk.bf16.vlgmr.msra.gmra.mrb[28].mxu0 %vm95_vm0, %v1576_v5 }
 0xc3b   :  { %v1637_v14 = vpop.f32.mrb[28].mxu0 }
 0xc3c   :  { %v1638_v17 = vadd.f32 %v1783_v11, %v1637_v14  ;;  %v2015_v18 = vpop.f32.mrb[29].mxu0 }
 0xc3d   :  { %v1640_v20 = vpop.f32.mrb[30].mxu0 }
 0xc3e   :  { %v1643_v21 = vmax.f32 %v1638_v17, 0.0  ;;  %v2016_v23 = vpop.f32.mrb[31].mxu0 }
 0xc40   :  { %v1644_v55 = vpack.c.bf16 %v1643_v21, %v1643_v21 }
 0xc42   :  { %2022 = vmatmul.mubr.msk.bf16.vlgmr.msra.gmra.mrb[32].mxu1 %vm95_vm0, %v1644_v55 }
 0xd15   :  { %v1705_v58 = vpop.f32.mrb[32].mxu1 }
 0xd16   :  { %v1706_v19 = vadd.f32 %v1787_v32, %v1705_v58  ;;  %v2023_v24 = vpop.f32.mrb[33].mxu1 }
 0xd17   :  { %v1708_v15 = vpop.f32.mrb[34].mxu1 }
 0xd18   :  { %v2024_v12 = vpop.f32.mrb[35].mxu1  ;;  %1712 = vst.msk [vmem:[#allocation4] sm:$0x3] %vm1711_vm6, %v1706_v19 }
 0xd19   :  { %2164 = shalt.err (!%p2161_p4)
}
 0xd1a   :  { %s2165_s19 = scalar_lea.hbm %s2675_s20, 32 }
 0xd1b   :  { %p2166_p5 = scmp.ne.s32.totalorder %s2675_s20, %s2165_s19  ;;  %p2169_p6 = scmp.lt.u32.totalorder %s2165_s19, %s2675_s20 }
 0xd1d   :  { %p2171_p7 = pnand %p2169_p6, %p2166_p5 }
 0xd1f   :  { %2174 = shalt.err (!%p2171_p7)
}
 0xd20   :  { %1722 = dma.vmem_to_hbm [thread:$0]  %s1720_s18, 32, %s2675_s20, [#allocation5]  }
 0xd21   :  { %2175 = dma.done.wait [#allocation5], 32  }
 0xd22   :  { %2176 = vsyncadd [#allocation5], 4294967264 }
 0xd23   :  { %1726 = vsyncpa [#allocation5], 1 }

</bundles_post_ra>
